<compile_context>
chip_gen: v6e
topology: v6e:2x2x1
jax: 0.10.0
libtpu: 0.0.40
codegen_flags: <defaults>
</compile_context>

<pallas_src>
import functools

import numpy as np
import jax
import jax.numpy as jnp
from jax.experimental import pallas as pl
from jax.experimental.pallas import tpu as pltpu


NMOL_PAD = 128                           # molecule axis padded to a full lane width
NOUT_PAD = 16                            # fused head rows: 5 multiharmonic + 4 OPLS + pad
INV_OPLS = np.float32(1.0 / 1.000001)    # replaces the '/ 1.000001' divide (keep it!)
HIGH = jax.lax.Precision.HIGHEST


def _default_bf16_tanh():
    """bf16 tanh on chips with bf16 VPU/EUP (v6e, v7x); f32 on v5e and older."""
    try:
        kind = jax.devices()[0].device_kind.lower()
    except Exception:
        return True
    return not any(tag in kind for tag in ("v2", "v3", "v4", "v5"))


def _pick_tile(nd):
    """Largest tile in {2048,1024,512,256} that still leaves >=2 grid steps.

    Per-grid-step overhead (~0.35us) dominates at small tiles, while even a 2048-row tile
    is only a few MiB of double-buffered VMEM; keeping >=2 tiles lets the "parallel" grid
    axis feed both v7x TensorCores."""
    for t in (2048, 1024, 512, 256):
        if nd >= 2 * t:
            return t
    return 256


# --------------------------------------------------------------------------------------
# Kernel
# --------------------------------------------------------------------------------------
def dihedral_kernel(cos_ref, x1_ref, x2_ref, bnd_ref,
                    nw0, nb0, nw1, nb1,
                    hw0, hb0, hw1, hb1, hw2, hb2,
                    out_ref, *, tanh_bf16):
    bf16 = jnp.bfloat16
    act = bf16 if tanh_bf16 else jnp.float32

    def tanh_layer(wt, bt, x):
        # wt [fout, fin] bf16 (Ref), bt [fout, 1] f32 (Ref), x [fin, T] bf16 -> bf16
        pre = jnp.dot(wt[...], x, preferred_element_type=jnp.float32) + bt[...]
        return jnp.tanh(pre.astype(act)).astype(bf16)

    # shared 'nonlinear' MLP (first two layers; its last linear layer is folded into hw0)
    def shared(x_ref):
        return tanh_layer(nw1, nb1, tanh_layer(nw0, nb0, x_ref[...]))

    h = shared(x1_ref) + shared(x2_ref)                       # [H, T] bf16 (pair sum)

    # fused multiharmonic + OPLS head (nw2/nb2 already folded into hw0/hb0)
    h = tanh_layer(hw1, hb1, tanh_layer(hw0, hb0, h))
    coef = jnp.dot(hw2[...], h, preferred_element_type=jnp.float32) + hb2[...]  # [16,T]

    c = cos_ref[...]                                          # [1, T] f32
    # multiharmonic: sum_m A_m cos^m (Horner).  Row 0 also carries the folded OPLS
    # constant 0.5 * sum_m V_m.
    e = coef[4:5]
    e = coef[3:4] + c * e
    e = coef[2:3] + c * e
    e = coef[1:2] + c * e
    e = coef[0:1] + c * e
    # OPLS: rows 5..8 are already (+-)V_m/2; cos(k*acos(x)) expanded via Chebyshev
    # identities, valid because |x| <= 1/1.000001 (do NOT drop INV_OPLS).
    x = c * INV_OPLS
    xx = x * x
    cos2 = 2.0 * xx - 1.0
    cos3 = x * (4.0 * xx - 3.0)
    cos4 = 2.0 * cos2 * cos2 - 1.0
    e = e + coef[5:6] * x + coef[6:7] * cos2 + coef[7:8] * cos3 + coef[8:9] * cos4

    # in-kernel segment one-hot from per-molecule [lo, hi) global dihedral-index ranges
    T = c.shape[1]
    t0 = pl.program_id(0) * T
    gidx = t0 + jax.lax.broadcasted_iota(jnp.int32, (T, NMOL_PAD), 0)     # [T, 128]
    mask = (gidx >= bnd_ref[0:1, :]) & (gidx < bnd_ref[1:2, :])
    onehot = jnp.where(mask, jnp.float32(1.0), jnp.float32(0.0))          # [T, 128] f32

    part = jnp.dot(e, onehot, preferred_element_type=jnp.float32)         # [1, 128] f32
    out_ref[...] = part.reshape(out_ref.shape)


# --------------------------------------------------------------------------------------
# Parameter fusion (f32): transpose to [fout, fin], fold nw2/nb2 into the head's first
# layer, fuse the two heads block-diagonally, fold the OPLS 0.5/sign/constant factors.
# --------------------------------------------------------------------------------------
def _fuse_params(params):
    (nw0, nb0, nw1, nb1, nw2, nb2,
     mw0, mb0, mw1, mb1, mw2, mb2,
     ow0, ob0, ow1, ob1, ow2, ob2) = params
    f32 = jnp.float32
    tw = lambda w: jnp.asarray(w, f32).T          # [fin, fout] -> [fout, fin]
    tb = lambda b: jnp.asarray(b, f32).T          # [1, fout]   -> [fout, 1]

    # shared MLP: only the first two layers stay; nw2/nb2 are folded into the head.
    shared = (tw(nw0), tb(nb0), tw(nw1), tb(nb1))

    h0m, h0o = mw0.shape[1], ow0.shape[1]
    h1m, h1o = mw1.shape[1], ow1.shape[1]
    n_mh, n_op = mw2.shape[1], ow2.shape[1]
    assert n_mh == 5 and n_op == 4 and n_mh + n_op <= NOUT_PAD

    # head layer 0, with the shared-MLP output layer folded in:
    #   hw0' = [mw0;ow0]^T @ nw2^T,  hb0' = [mw0;ow0]^T @ (2*nb2^T) + [mb0;ob0]^T
    w0_unf = jnp.concatenate([tw(mw0), tw(ow0)], axis=0)          # [h0m+h0o, H]
    b0_unf = jnp.concatenate([tb(mb0), tb(ob0)], axis=0)          # [h0m+h0o, 1]
    nw2T, nb2T = tw(nw2), tb(nb2)
    hw0 = jnp.dot(w0_unf, nw2T, precision=HIGH)                   # [h0m+h0o, H1]
    hb0 = jnp.dot(w0_unf, 2.0 * nb2T, precision=HIGH) + b0_unf

    # head layer 1: block-diagonal fusion of the two heads.
    hw1 = jnp.zeros((h1m + h1o, h0m + h0o), f32)
    hw1 = hw1.at[:h1m, :h0m].set(tw(mw1))
    hw1 = hw1.at[h1m:, h0m:].set(tw(ow1))
    hb1 = jnp.concatenate([tb(mb1), tb(ob1)], axis=0)

    # head layer 2 (padded to NOUT_PAD rows).  Rows 0..4: multiharmonic A_0..A_4 (row 0
    # also gets the OPLS constant 0.5*sum_m V_m); rows 5..8: (+-)V_m/2 for cos((m+1)phi).
    sgn = jnp.asarray([0.5, -0.5, 0.5, -0.5], f32)[:, None]
    mw2T, ow2T = tw(mw2), tw(ow2)
    mb2T, ob2T = tb(mb2), tb(ob2)
    hw2 = jnp.zeros((NOUT_PAD, h1m + h1o), f32)
    hw2 = hw2.at[:n_mh, :h1m].set(mw2T)
    hw2 = hw2.at[0:1, h1m:].set(0.5 * jnp.sum(ow2T, axis=0, keepdims=True))
    hw2 = hw2.at[n_mh:n_mh + n_op, h1m:].set(sgn * ow2T)
    hb2 = jnp.zeros((NOUT_PAD, 1), f32)
    hb2 = hb2.at[:n_mh, :].set(mb2T)
    hb2 = hb2.at[0:1, :].add(0.5 * jnp.sum(ob2T, axis=0, keepdims=True))
    hb2 = hb2.at[n_mh:n_mh + n_op, :].set(sgn * ob2T)

    return shared + (hw0, hb0, hw1, hb1, hw2, hb2)


# --------------------------------------------------------------------------------------
# Wrapper
# --------------------------------------------------------------------------------------
def dihedral_net_forward(r, xyz, dihedrals, num_dihedrals, params, *,
                         tile_nd=None, tanh_bf16=None):
    n_mol = len(num_dihedrals)
    nd = int(sum(num_dihedrals))
    if nd == 0:
        return jnp.zeros((n_mol,), jnp.float32)        # torch early-return
    assert n_mol <= NMOL_PAD

    if tanh_bf16 is None:
        tanh_bf16 = _default_bf16_tanh()
    if tile_nd is None:
        tile_nd = _pick_tile(nd)
    num_tiles = -(-nd // tile_nd)
    nd_pad = num_tiles * tile_nd
    pad = nd_pad - nd

    d0, d1, d2, d3 = (dihedrals[:, i] for i in range(4))

    # cos(dihedral angle), computed wrapper-side and shipped as one lane-dense f32 row.
    vec1 = xyz[d0] - xyz[d1]
    vec2 = xyz[d2] - xyz[d1]
    vec3 = xyz[d1] - xyz[d2]
    vec4 = xyz[d3] - xyz[d2]
    c1 = jnp.cross(vec1, vec2)
    c2 = jnp.cross(vec3, vec4)
    cos_phi = (c1 * c2).sum(-1) * jax.lax.rsqrt((c1 * c1).sum(-1) * (c2 * c2).sum(-1))
    cos_phi = jnp.pad(cos_phi.astype(jnp.float32), (0, pad))[None, :]     # [1, nd_pad]

    # shared-MLP inputs, lane-dense, two separate operands (no interleave copy).
    x1t = jnp.concatenate([r[d1], r[d0]], axis=1).T.astype(jnp.bfloat16)  # [2Fr, nd]
    x2t = jnp.concatenate([r[d2], r[d3]], axis=1).T.astype(jnp.bfloat16)
    if pad:
        x1t = jnp.pad(x1t, ((0, 0), (0, pad)))
        x2t = jnp.pad(x2t, ((0, 0), (0, pad)))
    two_fr = x1t.shape[0]

    # per-molecule [lo, hi) dihedral-index ranges (dihedrals are stored contiguously per
    # molecule); padded molecules / padded rows get empty ranges -> zero one-hot columns.
    off = np.concatenate([[0], np.cumsum(num_dihedrals)]).astype(np.int32)
    lo = np.zeros((NMOL_PAD,), np.int32)
    hi = np.zeros((NMOL_PAD,), np.int32)
    lo[:n_mol] = off[:-1]
    hi[:n_mol] = off[1:]
    bounds = jnp.asarray(np.stack([lo, hi]))                              # [2, 128] i32

    fused = _fuse_params(params)
    kops = [w.astype(jnp.bfloat16) if i % 2 == 0 else w for i, w in enumerate(fused)]
    ins = [cos_phi, x1t, x2t, bounds] + kops

    in_specs = [
        pl.BlockSpec((1, tile_nd), lambda i: (0, i)),
        pl.BlockSpec((two_fr, tile_nd), lambda i: (0, i)),
        pl.BlockSpec((two_fr, tile_nd), lambda i: (0, i)),
        pl.BlockSpec((2, NMOL_PAD), lambda i: (0, 0)),
    ] + [pl.BlockSpec(p.shape, lambda i: (0, 0)) for p in kops]
    out_specs = pl.BlockSpec((1, 1, NMOL_PAD), lambda i: (i, 0, 0))

    # advisory cost estimate (shared layers run on both atom pairs)
    w_shared = (kops[0], kops[2])
    w_head = (kops[4], kops[6], kops[8])
    flops_per_d = (2 * sum(2 * w.shape[0] * w.shape[1] for w in w_shared)
                   + sum(2 * w.shape[0] * w.shape[1] for w in w_head)
                   + 2 * NMOL_PAD + 40)
    tanh_per_d = 2 * (kops[0].shape[0] + kops[2].shape[0]) \
        + kops[4].shape[0] + kops[6].shape[0]
    cost = pl.CostEstimate(
        flops=int(flops_per_d) * nd_pad,
        transcendentals=int(tanh_per_d) * nd_pad,
        bytes_accessed=int(sum(int(a.size) * a.dtype.itemsize for a in ins)
                           + num_tiles * NMOL_PAD * 4),
    )

    partials = pl.pallas_call(
        functools.partial(dihedral_kernel, tanh_bf16=tanh_bf16),
        out_shape=jax.ShapeDtypeStruct((num_tiles, 1, NMOL_PAD), jnp.float32),
        grid=(num_tiles,),
        in_specs=in_specs,
        out_specs=out_specs,
        compiler_params=pltpu.CompilerParams(
            dimension_semantics=("parallel",),        # independent per-tile partial sums
            vmem_limit_bytes=32 * 1024 * 1024,
        ),
        cost_estimate=cost,
    )(*ins)

    return partials.sum(axis=(0, 1))[:n_mol]


# --------------------------------------------------------------------------------------
# References
# --------------------------------------------------------------------------------------
def init_params(key, Fr, Lh):
    """Deterministic synthetic parameters matching ParameterPredictor shapes."""
    def init_mlp(key, dims):
        ps = []
        for i in range(len(dims) - 1):
            key, kw, kb = jax.random.split(key, 3)
            w = jax.random.normal(kw, (dims[i], dims[i + 1]), jnp.float32) / np.sqrt(dims[i])
            b = 0.1 * jax.random.normal(kb, (1, dims[i + 1]), jnp.float32)
            ps += [w, b]
        return key, ps

    key, nonlinear = init_mlp(key, [2 * Fr] + Lh + [Lh[-1]])   # self.nonlinear
    key, mh = init_mlp(key, [Lh[-1]] + Lh + [5])               # multiharmonic head
    key, opls = init_mlp(key, [Lh[-1]] + Lh + [4])             # OPLS head
    return tuple(nonlinear + mh + opls)


def reference_forward(r, xyz, dihedrals, num_dihedrals, params):
    """Literal torch DihedralNet forward in pure f32 JAX (sqrt/divide, acos + cos)."""
    (nw0, nb0, nw1, nb1, nw2, nb2,
     mw0, mb0, mw1, mb1, mw2, mb2,
     ow0, ob0, ow1, ob1, ow2, ob2) = params

    def dense(x, w, b):
        return jnp.dot(x, w, precision=HIGH) + b

    def mlp(x, w0, b0, w1, b1, w2, b2):
        h = jnp.tanh(dense(x, w0, b0))
        h = jnp.tanh(dense(h, w1, b1))
        return dense(h, w2, b2)

    d0, d1, d2, d3 = (dihedrals[:, i] for i in range(4))
    vec1 = xyz[d0] - xyz[d1]
    vec2 = xyz[d2] - xyz[d1]
    vec3 = xyz[d1] - xyz[d2]
    vec4 = xyz[d3] - xyz[d2]
    cross1 = jnp.cross(vec1, vec2)
    cross2 = jnp.cross(vec3, vec4)
    norm = jnp.sqrt((cross1 ** 2).sum(1) * (cross2 ** 2).sum(1))
    cos_phi = ((cross1 * cross2).sum(1) / norm)[:, None]

    pair1 = mlp(jnp.concatenate([r[d1], r[d0]], 1), nw0, nb0, nw1, nb1, nw2, nb2)
    pair2 = mlp(jnp.concatenate([r[d2], r[d3]], 1), nw0, nb0, nw1, nb1, nw2, nb2)
    di = pair1 + pair2

    E = jnp.zeros_like(cos_phi)
    mh = mlp(di, mw0, mb0, mw1, mb1, mw2, mb2)
    for m in range(5):
        E = E + mh[:, m:m + 1] * cos_phi ** m
    opls = mlp(di, ow0, ob0, ow1, ob1, ow2, ob2)
    phi = jnp.arccos(cos_phi / 1.000001)
    for m in range(4):
        E = E + opls[:, m:m + 1] / 2 * (1 + (-1) ** m * jnp.cos((m + 1) * phi))

    n_mol = len(num_dihedrals)
    mol_id = jnp.asarray(np.repeat(np.arange(n_mol), num_dihedrals))
    seg = jax.nn.one_hot(mol_id, n_mol, dtype=jnp.float32)
    return jnp.dot(E[:, 0], seg, precision=HIGH)


def fused_reference(r, xyz, dihedrals, num_dihedrals, fused, *, use_bf16, tanh_bf16):
    """Plain-JAX (XLA) emulation of the kernel math on the fused/folded parameters.
    use_bf16=True mirrors the kernel's bf16 MXU casts; use_bf16=False runs f32 end-to-end
    (used to validate the algebraic folds against the literal torch forward)."""
    nw0, nb0, nw1, nb1, hw0, hb0, hw1, hb1, hw2, hb2 = fused
    f32, bf16 = jnp.float32, jnp.bfloat16
    op = bf16 if use_bf16 else f32
    act = (bf16 if tanh_bf16 else f32) if use_bf16 else f32
    prec = None if use_bf16 else HIGH

    def dense(wt, bt, x):
        return jnp.dot(wt.astype(op), x.astype(op),
                       preferred_element_type=f32, precision=prec) + bt

    def tanh_layer(wt, bt, x):
        return jnp.tanh(dense(wt, bt, x).astype(act)).astype(op)

    d0, d1, d2, d3 = (dihedrals[:, i] for i in range(4))
    vec1 = xyz[d0] - xyz[d1]
    vec2 = xyz[d2] - xyz[d1]
    vec3 = xyz[d1] - xyz[d2]
    vec4 = xyz[d3] - xyz[d2]
    c1 = jnp.cross(vec1, vec2)
    c2 = jnp.cross(vec3, vec4)
    c = ((c1 * c2).sum(-1) * jax.lax.rsqrt((c1 * c1).sum(-1) * (c2 * c2).sum(-1)))[None, :]

    x1t = jnp.concatenate([r[d1], r[d0]], axis=1).T
    x2t = jnp.concatenate([r[d2], r[d3]], axis=1).T

    def shared(x):
        return tanh_layer(nw1, nb1, tanh_layer(nw0, nb0, x))

    h = shared(x1t) + shared(x2t)
    h = tanh_layer(hw1, hb1, tanh_layer(hw0, hb0, h))
    coef = dense(hw2, hb2, h)                                   # [16, Nd] f32

    e = coef[4:5]
    for row in (coef[3:4], coef[2:3], coef[1:2], coef[0:1]):
        e = row + c * e
    x = c * INV_OPLS
    xx = x * x
    cos2 = 2.0 * xx - 1.0
    cos3 = x * (4.0 * xx - 3.0)
    cos4 = 2.0 * cos2 * cos2 - 1.0
    e = e + coef[5:6] * x + coef[6:7] * cos2 + coef[7:8] * cos3 + coef[8:9] * cos4

    n_mol = len(num_dihedrals)
    mol_id = jnp.asarray(np.repeat(np.arange(n_mol), num_dihedrals))
    seg = jax.nn.one_hot(mol_id, n_mol, dtype=jnp.float32)
    return jnp.dot(e[0], seg, precision=HIGH)


if __name__ == "__main__":
    Fr = 32
    Lh = [32, 32]
    n_atoms = 32
    num_dihedrals = [250, 230]          # Nd = 480 -> two 256-row tiles, 32 padded rows
    nd = sum(num_dihedrals)

    key = jax.random.PRNGKey(0)
    kr, kx, kp = jax.random.split(key, 3)
    r = jax.random.normal(kr, (n_atoms, Fr), jnp.float32)          # atom features
    xyz = 2.0 * jax.random.normal(kx, (n_atoms, 3), jnp.float32)   # atom coordinates

    rng = np.random.default_rng(0)
    dihedrals = jnp.asarray(
        np.stack([rng.choice(n_atoms, size=4, replace=False) for _ in range(nd)]),
        dtype=jnp.int32,
    )

    params = init_params(kp, Fr, Lh)
    tanh_bf16 = _default_bf16_tanh()

    out = jax.block_until_ready(
        dihedral_net_forward(r, xyz, dihedrals, num_dihedrals, params,
                             tanh_bf16=tanh_bf16))

    fused = _fuse_params(params)

    # (1) Pallas plumbing (tiling, pipelining, in-kernel one-hot, MXU) vs an XLA
    #     emulation of the same bf16 math.
    ref_bf16 = fused_reference(r, xyz, dihedrals, num_dihedrals, fused,
                               use_bf16=True, tanh_bf16=tanh_bf16)
    np.testing.assert_allclose(np.asarray(out), np.asarray(ref_bf16),
                               rtol=2e-2, atol=1.0)

    # (2) The algebraic rewrites (nw2 fold, OPLS sign/constant fold, Chebyshev, rsqrt)
    #     vs the literal torch forward, both in f32.
    ref_fused_f32 = fused_reference(r, xyz, dihedrals, num_dihedrals, fused,
                                    use_bf16=False, tanh_bf16=False)
    ref_torch_f32 = reference_forward(r, xyz, dihedrals, num_dihedrals, params)
    np.testing.assert_allclose(np.asarray(ref_fused_f32), np.asarray(ref_torch_f32),
                               rtol=2e-3, atol=0.1)

    # (3) ZeroNet configuration (trainable=False): all predictors ZeroNet -> zero energy.
    zero_params = tuple(jnp.zeros_like(p) for p in params)
    out0 = jax.block_until_ready(
        dihedral_net_forward(r, xyz, dihedrals, num_dihedrals, zero_params,
                             tanh_bf16=tanh_bf16))
    np.testing.assert_allclose(np.asarray(out0),
                               np.zeros(len(num_dihedrals), np.float32), atol=1e-6)

    print("KERNEL_OK")
</pallas_src>

<mosaic_0001>
module attributes {stable_mosaic.version = 11 : i64} {
  func.func @dihedral_kernel(%arg0: i32, %arg1: memref<1x256xf32, #tpu.memory_space<vmem>>, %arg2: memref<64x256xbf16, #tpu.memory_space<vmem>>, %arg3: memref<64x256xbf16, #tpu.memory_space<vmem>>, %arg4: memref<2x128xi32, #tpu.memory_space<vmem>>, %arg5: memref<32x64xbf16, #tpu.memory_space<vmem>>, %arg6: memref<32x1xf32, #tpu.memory_space<vmem>>, %arg7: memref<32x32xbf16, #tpu.memory_space<vmem>>, %arg8: memref<32x1xf32, #tpu.memory_space<vmem>>, %arg9: memref<64x32xbf16, #tpu.memory_space<vmem>>, %arg10: memref<64x1xf32, #tpu.memory_space<vmem>>, %arg11: memref<64x64xbf16, #tpu.memory_space<vmem>>, %arg12: memref<64x1xf32, #tpu.memory_space<vmem>>, %arg13: memref<16x64xbf16, #tpu.memory_space<vmem>>, %arg14: memref<16x1xf32, #tpu.memory_space<vmem>>, %arg15: memref<1x1x128xf32, #tpu.memory_space<vmem>>) attributes {dimension_semantics = [#tpu.dimension_semantics<parallel>], iteration_bounds = array<i64: 2>, scalar_prefetch = 0 : i64, scratch_operands = 0 : i64, tpu.core_type = #tpu.core_type<tc>, window_params = [{transform_indices = @transform_0, window_bounds = array<i64: 1, 256>}, {transform_indices = @transform_1, window_bounds = array<i64: 64, 256>}, {transform_indices = @transform_2, window_bounds = array<i64: 64, 256>}, {pipeline_mode = #tpu.pipeline_mode<synchronous>, transform_indices = @transform_3, window_bounds = array<i64: 2, 128>}, {pipeline_mode = #tpu.pipeline_mode<synchronous>, transform_indices = @transform_4, window_bounds = array<i64: 32, 64>}, {pipeline_mode = #tpu.pipeline_mode<synchronous>, transform_indices = @transform_5, window_bounds = array<i64: 32, 1>}, {pipeline_mode = #tpu.pipeline_mode<synchronous>, transform_indices = @transform_6, window_bounds = array<i64: 32, 32>}, {pipeline_mode = #tpu.pipeline_mode<synchronous>, transform_indices = @transform_7, window_bounds = array<i64: 32, 1>}, {pipeline_mode = #tpu.pipeline_mode<synchronous>, transform_indices = @transform_8, window_bounds = array<i64: 64, 32>}, {pipeline_mode = #tpu.pipeline_mode<synchronous>, transform_indices = @transform_9, window_bounds = array<i64: 64, 1>}, {pipeline_mode = #tpu.pipeline_mode<synchronous>, transform_indices = @transform_10, window_bounds = array<i64: 64, 64>}, {pipeline_mode = #tpu.pipeline_mode<synchronous>, transform_indices = @transform_11, window_bounds = array<i64: 64, 1>}, {pipeline_mode = #tpu.pipeline_mode<synchronous>, transform_indices = @transform_12, window_bounds = array<i64: 16, 64>}, {pipeline_mode = #tpu.pipeline_mode<synchronous>, transform_indices = @transform_13, window_bounds = array<i64: 16, 1>}, {transform_indices = @transform_14, window_bounds = array<i64: 1, 1, 128>}]} {
    %c0 = arith.constant 0 : index
    %c0_0 = arith.constant 0 : index
    %0 = vector.load %arg2[%c0, %c0_0] : memref<64x256xbf16, #tpu.memory_space<vmem>>, vector<64x256xbf16>
    %c0_1 = arith.constant 0 : index
    %c0_2 = arith.constant 0 : index
    %1 = vector.load %arg5[%c0_1, %c0_2] : memref<32x64xbf16, #tpu.memory_space<vmem>>, vector<32x64xbf16>
    %cst = arith.constant dense<0.000000e+00> : vector<32x256xf32>
    %2 = tpu.matmul %1, %0, %cst {dimension_numbers = #tpu.dot_dimension_numbers<[1], [0], [0], [1], [0, 0, 1, 1], [], []>} : vector<32x64xbf16>, vector<64x256xbf16>, vector<32x256xf32> -> vector<32x256xf32>
    %c0_3 = arith.constant 0 : index
    %c0_4 = arith.constant 0 : index
    %3 = vector.load %arg6[%c0_3, %c0_4] : memref<32x1xf32, #tpu.memory_space<vmem>>, vector<32x1xf32>
    %4 = vector.broadcast %3 : vector<32x1xf32> to vector<32x256xf32>
    %5 = arith.addf %2, %4 : vector<32x256xf32>
    %6 = arith.truncf %5 : vector<32x256xf32> to vector<32x256xbf16>
    %7 = math.tanh %6 : vector<32x256xbf16>
    %c0_5 = arith.constant 0 : index
    %c0_6 = arith.constant 0 : index
    %8 = vector.load %arg7[%c0_5, %c0_6] : memref<32x32xbf16, #tpu.memory_space<vmem>>, vector<32x32xbf16>
    %cst_7 = arith.constant dense<0.000000e+00> : vector<32x256xf32>
    %9 = tpu.matmul %8, %7, %cst_7 {dimension_numbers = #tpu.dot_dimension_numbers<[1], [0], [0], [1], [0, 0, 1, 1], [], []>} : vector<32x32xbf16>, vector<32x256xbf16>, vector<32x256xf32> -> vector<32x256xf32>
    %c0_8 = arith.constant 0 : index
    %c0_9 = arith.constant 0 : index
    %10 = vector.load %arg8[%c0_8, %c0_9] : memref<32x1xf32, #tpu.memory_space<vmem>>, vector<32x1xf32>
    %11 = vector.broadcast %10 : vector<32x1xf32> to vector<32x256xf32>
    %12 = arith.addf %9, %11 : vector<32x256xf32>
    %13 = arith.truncf %12 : vector<32x256xf32> to vector<32x256xbf16>
    %14 = math.tanh %13 : vector<32x256xbf16>
    %c0_10 = arith.constant 0 : index
    %c0_11 = arith.constant 0 : index
    %15 = vector.load %arg3[%c0_10, %c0_11] : memref<64x256xbf16, #tpu.memory_space<vmem>>, vector<64x256xbf16>
    %c0_12 = arith.constant 0 : index
    %c0_13 = arith.constant 0 : index
    %16 = vector.load %arg5[%c0_12, %c0_13] : memref<32x64xbf16, #tpu.memory_space<vmem>>, vector<32x64xbf16>
    %cst_14 = arith.constant dense<0.000000e+00> : vector<32x256xf32>
    %17 = tpu.matmul %16, %15, %cst_14 {dimension_numbers = #tpu.dot_dimension_numbers<[1], [0], [0], [1], [0, 0, 1, 1], [], []>} : vector<32x64xbf16>, vector<64x256xbf16>, vector<32x256xf32> -> vector<32x256xf32>
    %c0_15 = arith.constant 0 : index
    %c0_16 = arith.constant 0 : index
    %18 = vector.load %arg6[%c0_15, %c0_16] : memref<32x1xf32, #tpu.memory_space<vmem>>, vector<32x1xf32>
    %19 = vector.broadcast %18 : vector<32x1xf32> to vector<32x256xf32>
    %20 = arith.addf %17, %19 : vector<32x256xf32>
    %21 = arith.truncf %20 : vector<32x256xf32> to vector<32x256xbf16>
    %22 = math.tanh %21 : vector<32x256xbf16>
    %c0_17 = arith.constant 0 : index
    %c0_18 = arith.constant 0 : index
    %23 = vector.load %arg7[%c0_17, %c0_18] : memref<32x32xbf16, #tpu.memory_space<vmem>>, vector<32x32xbf16>
    %cst_19 = arith.constant dense<0.000000e+00> : vector<32x256xf32>
    %24 = tpu.matmul %23, %22, %cst_19 {dimension_numbers = #tpu.dot_dimension_numbers<[1], [0], [0], [1], [0, 0, 1, 1], [], []>} : vector<32x32xbf16>, vector<32x256xbf16>, vector<32x256xf32> -> vector<32x256xf32>
    %c0_20 = arith.constant 0 : index
    %c0_21 = arith.constant 0 : index
    %25 = vector.load %arg8[%c0_20, %c0_21] : memref<32x1xf32, #tpu.memory_space<vmem>>, vector<32x1xf32>
    %26 = vector.broadcast %25 : vector<32x1xf32> to vector<32x256xf32>
    %27 = arith.addf %24, %26 : vector<32x256xf32>
    %28 = arith.truncf %27 : vector<32x256xf32> to vector<32x256xbf16>
    %29 = math.tanh %28 : vector<32x256xbf16>
    %30 = arith.addf %14, %29 : vector<32x256xbf16>
    %c0_22 = arith.constant 0 : index
    %c0_23 = arith.constant 0 : index
    %31 = vector.load %arg9[%c0_22, %c0_23] : memref<64x32xbf16, #tpu.memory_space<vmem>>, vector<64x32xbf16>
    %cst_24 = arith.constant dense<0.000000e+00> : vector<64x256xf32>
    %32 = tpu.matmul %31, %30, %cst_24 {dimension_numbers = #tpu.dot_dimension_numbers<[1], [0], [0], [1], [0, 0, 1, 1], [], []>} : vector<64x32xbf16>, vector<32x256xbf16>, vector<64x256xf32> -> vector<64x256xf32>
    %c0_25 = arith.constant 0 : index
    %c0_26 = arith.constant 0 : index
    %33 = vector.load %arg10[%c0_25, %c0_26] : memref<64x1xf32, #tpu.memory_space<vmem>>, vector<64x1xf32>
    %34 = vector.broadcast %33 : vector<64x1xf32> to vector<64x256xf32>
    %35 = arith.addf %32, %34 : vector<64x256xf32>
    %36 = arith.truncf %35 : vector<64x256xf32> to vector<64x256xbf16>
    %37 = math.tanh %36 : vector<64x256xbf16>
    %c0_27 = arith.constant 0 : index
    %c0_28 = arith.constant 0 : index
    %38 = vector.load %arg11[%c0_27, %c0_28] : memref<64x64xbf16, #tpu.memory_space<vmem>>, vector<64x64xbf16>
    %cst_29 = arith.constant dense<0.000000e+00> : vector<64x256xf32>
    %39 = tpu.matmul %38, %37, %cst_29 {dimension_numbers = #tpu.dot_dimension_numbers<[1], [0], [0], [1], [0, 0, 1, 1], [], []>} : vector<64x64xbf16>, vector<64x256xbf16>, vector<64x256xf32> -> vector<64x256xf32>
    %c0_30 = arith.constant 0 : index
    %c0_31 = arith.constant 0 : index
    %40 = vector.load %arg12[%c0_30, %c0_31] : memref<64x1xf32, #tpu.memory_space<vmem>>, vector<64x1xf32>
    %41 = vector.broadcast %40 : vector<64x1xf32> to vector<64x256xf32>
    %42 = arith.addf %39, %41 : vector<64x256xf32>
    %43 = arith.truncf %42 : vector<64x256xf32> to vector<64x256xbf16>
    %44 = math.tanh %43 : vector<64x256xbf16>
    %c0_32 = arith.constant 0 : index
    %c0_33 = arith.constant 0 : index
    %45 = vector.load %arg13[%c0_32, %c0_33] : memref<16x64xbf16, #tpu.memory_space<vmem>>, vector<16x64xbf16>
    %cst_34 = arith.constant dense<0.000000e+00> : vector<16x256xf32>
    %46 = tpu.matmul %45, %44, %cst_34 {dimension_numbers = #tpu.dot_dimension_numbers<[1], [0], [0], [1], [0, 0, 1, 1], [], []>} : vector<16x64xbf16>, vector<64x256xbf16>, vector<16x256xf32> -> vector<16x256xf32>
    %c0_35 = arith.constant 0 : index
    %c0_36 = arith.constant 0 : index
    %47 = vector.load %arg14[%c0_35, %c0_36] : memref<16x1xf32, #tpu.memory_space<vmem>>, vector<16x1xf32>
    %48 = vector.broadcast %47 : vector<16x1xf32> to vector<16x256xf32>
    %49 = arith.addf %46, %48 : vector<16x256xf32>
    %c0_37 = arith.constant 0 : index
    %c0_38 = arith.constant 0 : index
    %50 = vector.load %arg1[%c0_37, %c0_38] : memref<1x256xf32, #tpu.memory_space<vmem>>, vector<1x256xf32>
    %51 = vector.extract_strided_slice %49 {offsets = [4, 0], sizes = [1, 256], strides = [1, 1]} : vector<16x256xf32> to vector<1x256xf32>
    %52 = vector.extract_strided_slice %49 {offsets = [3, 0], sizes = [1, 256], strides = [1, 1]} : vector<16x256xf32> to vector<1x256xf32>
    %53 = arith.mulf %50, %51 : vector<1x256xf32>
    %54 = arith.addf %52, %53 : vector<1x256xf32>
    %55 = vector.extract_strided_slice %49 {offsets = [2, 0], sizes = [1, 256], strides = [1, 1]} : vector<16x256xf32> to vector<1x256xf32>
    %56 = arith.mulf %50, %54 : vector<1x256xf32>
    %57 = arith.addf %55, %56 : vector<1x256xf32>
    %58 = vector.extract_strided_slice %49 {offsets = [1, 0], sizes = [1, 256], strides = [1, 1]} : vector<16x256xf32> to vector<1x256xf32>
    %59 = arith.mulf %50, %57 : vector<1x256xf32>
    %60 = arith.addf %58, %59 : vector<1x256xf32>
    %61 = vector.extract_strided_slice %49 {offsets = [0, 0], sizes = [1, 256], strides = [1, 1]} : vector<16x256xf32> to vector<1x256xf32>
    %62 = arith.mulf %50, %60 : vector<1x256xf32>
    %63 = arith.addf %61, %62 : vector<1x256xf32>
    %cst_39 = arith.constant 0.999998986 : f32
    %64 = vector.broadcast %cst_39 : f32 to vector<1x256xf32>
    %65 = arith.mulf %50, %64 : vector<1x256xf32>
    %66 = arith.mulf %65, %65 : vector<1x256xf32>
    %cst_40 = arith.constant 2.000000e+00 : f32
    %67 = vector.broadcast %cst_40 : f32 to vector<1x256xf32>
    %68 = arith.mulf %67, %66 : vector<1x256xf32>
    %cst_41 = arith.constant 1.000000e+00 : f32
    %69 = vector.broadcast %cst_41 : f32 to vector<1x256xf32>
    %70 = arith.subf %68, %69 : vector<1x256xf32>
    %cst_42 = arith.constant 4.000000e+00 : f32
    %71 = vector.broadcast %cst_42 : f32 to vector<1x256xf32>
    %72 = arith.mulf %71, %66 : vector<1x256xf32>
    %cst_43 = arith.constant 3.000000e+00 : f32
    %73 = vector.broadcast %cst_43 : f32 to vector<1x256xf32>
    %74 = arith.subf %72, %73 : vector<1x256xf32>
    %75 = arith.mulf %65, %74 : vector<1x256xf32>
    %cst_44 = arith.constant 2.000000e+00 : f32
    %76 = vector.broadcast %cst_44 : f32 to vector<1x256xf32>
    %77 = arith.mulf %76, %70 : vector<1x256xf32>
    %78 = arith.mulf %77, %70 : vector<1x256xf32>
    %cst_45 = arith.constant 1.000000e+00 : f32
    %79 = vector.broadcast %cst_45 : f32 to vector<1x256xf32>
    %80 = arith.subf %78, %79 : vector<1x256xf32>
    %81 = vector.extract_strided_slice %49 {offsets = [5, 0], sizes = [1, 256], strides = [1, 1]} : vector<16x256xf32> to vector<1x256xf32>
    %82 = arith.mulf %81, %65 : vector<1x256xf32>
    %83 = arith.addf %63, %82 : vector<1x256xf32>
    %84 = vector.extract_strided_slice %49 {offsets = [6, 0], sizes = [1, 256], strides = [1, 1]} : vector<16x256xf32> to vector<1x256xf32>
    %85 = arith.mulf %84, %70 : vector<1x256xf32>
    %86 = arith.addf %83, %85 : vector<1x256xf32>
    %87 = vector.extract_strided_slice %49 {offsets = [7, 0], sizes = [1, 256], strides = [1, 1]} : vector<16x256xf32> to vector<1x256xf32>
    %88 = arith.mulf %87, %75 : vector<1x256xf32>
    %89 = arith.addf %86, %88 : vector<1x256xf32>
    %90 = vector.extract_strided_slice %49 {offsets = [8, 0], sizes = [1, 256], strides = [1, 1]} : vector<16x256xf32> to vector<1x256xf32>
    %91 = arith.mulf %90, %80 : vector<1x256xf32>
    %92 = arith.addf %89, %91 : vector<1x256xf32>
    %c256_i32 = arith.constant 256 : i32
    %93 = arith.muli %arg0, %c256_i32 : i32
    %94 = tpu.iota {dimensions = array<i32: 0>} : vector<256x128xi32>
    %95 = vector.broadcast %93 : i32 to vector<256x128xi32>
    %96 = arith.addi %95, %94 : vector<256x128xi32>
    %c0_46 = arith.constant 0 : index
    %c0_47 = arith.constant 0 : index
    %97 = vector.load %arg4[%c0_46, %c0_47] : memref<2x128xi32, #tpu.memory_space<vmem>>, vector<1x128xi32>
    %98 = vector.broadcast %97 : vector<1x128xi32> to vector<256x128xi32>
    %99 = arith.cmpi sge, %96, %98 : vector<256x128xi32>
    %c1 = arith.constant 1 : index
    %c0_48 = arith.constant 0 : index
    %100 = vector.load %arg4[%c1, %c0_48] : memref<2x128xi32, #tpu.memory_space<vmem>>, vector<1x128xi32>
    %101 = vector.broadcast %100 : vector<1x128xi32> to vector<256x128xi32>
    %102 = arith.cmpi slt, %96, %101 : vector<256x128xi32>
    %103 = arith.andi %99, %102 : vector<256x128xi1>
    %cst_49 = arith.constant 1.000000e+00 : f32
    %cst_50 = arith.constant 0.000000e+00 : f32
    %104 = vector.broadcast %cst_49 : f32 to vector<256x128xf32>
    %105 = vector.broadcast %cst_50 : f32 to vector<256x128xf32>
    %106 = arith.select %103, %104, %105 : vector<256x128xi1>, vector<256x128xf32>
    %cst_51 = arith.constant dense<0.000000e+00> : vector<1x128xf32>
    %107 = tpu.matmul %92, %106, %cst_51 {dimension_numbers = #tpu.dot_dimension_numbers<[1], [0], [0], [1], [0, 0, 1, 1], [], []>} : vector<1x256xf32>, vector<256x128xf32>, vector<1x128xf32> -> vector<1x128xf32>
    %108 = vector.shape_cast %107 : vector<1x128xf32> to vector<1x1x128xf32>
    %c0_52 = arith.constant 0 : index
    %c0_53 = arith.constant 0 : index
    %c0_54 = arith.constant 0 : index
    %109 = vector.load %arg15[%c0_52, %c0_53, %c0_54] : memref<1x1x128xf32, #tpu.memory_space<vmem>>, vector<1x1x128xf32>
    tpu.vector_store %arg15[%c0_52, %c0_53, %c0_54], %108 {strides = array<i32>} : memref<1x1x128xf32, #tpu.memory_space<vmem>>, vector<1x1x128xf32>,
    return
  }
  func.func @transform_0(%arg0: i32) -> (i32, i32) {
    %c0_i32 = arith.constant 0 : i32
    %c0_i32_0 = arith.constant 0 : i32
    return %c0_i32, %arg0 : i32, i32
  }
  func.func @transform_1(%arg0: i32) -> (i32, i32) {
    %c0_i32 = arith.constant 0 : i32
    %c0_i32_0 = arith.constant 0 : i32
    return %c0_i32, %arg0 : i32, i32
  }
  func.func @transform_2(%arg0: i32) -> (i32, i32) {
    %c0_i32 = arith.constant 0 : i32
    %c0_i32_0 = arith.constant 0 : i32
    return %c0_i32, %arg0 : i32, i32
  }
  func.func @transform_3(%arg0: i32) -> (i32, i32) {
    %c0_i32 = arith.constant 0 : i32
    %c0_i32_0 = arith.constant 0 : i32
    %c0_i32_1 = arith.constant 0 : i32
    return %c0_i32, %c0_i32_0 : i32, i32
  }
  func.func @transform_4(%arg0: i32) -> (i32, i32) {
    %c0_i32 = arith.constant 0 : i32
    %c0_i32_0 = arith.constant 0 : i32
    %c0_i32_1 = arith.constant 0 : i32
    return %c0_i32, %c0_i32_0 : i32, i32
  }
  func.func @transform_5(%arg0: i32) -> (i32, i32) {
    %c0_i32 = arith.constant 0 : i32
    %c0_i32_0 = arith.constant 0 : i32
    %c0_i32_1 = arith.constant 0 : i32
    return %c0_i32, %c0_i32_0 : i32, i32
  }
  func.func @transform_6(%arg0: i32) -> (i32, i32) {
    %c0_i32 = arith.constant 0 : i32
    %c0_i32_0 = arith.constant 0 : i32
    %c0_i32_1 = arith.constant 0 : i32
    return %c0_i32, %c0_i32_0 : i32, i32
  }
  func.func @transform_7(%arg0: i32) -> (i32, i32) {
    %c0_i32 = arith.constant 0 : i32
    %c0_i32_0 = arith.constant 0 : i32
    %c0_i32_1 = arith.constant 0 : i32
    return %c0_i32, %c0_i32_0 : i32, i32
  }
  func.func @transform_8(%arg0: i32) -> (i32, i32) {
    %c0_i32 = arith.constant 0 : i32
    %c0_i32_0 = arith.constant 0 : i32
    %c0_i32_1 = arith.constant 0 : i32
    return %c0_i32, %c0_i32_0 : i32, i32
  }
  func.func @transform_9(%arg0: i32) -> (i32, i32) {
    %c0_i32 = arith.constant 0 : i32
    %c0_i32_0 = arith.constant 0 : i32
    %c0_i32_1 = arith.constant 0 : i32
    return %c0_i32, %c0_i32_0 : i32, i32
  }
  func.func @transform_10(%arg0: i32) -> (i32, i32) {
    %c0_i32 = arith.constant 0 : i32
    %c0_i32_0 = arith.constant 0 : i32
    %c0_i32_1 = arith.constant 0 : i32
    return %c0_i32, %c0_i32_0 : i32, i32
  }
  func.func @transform_11(%arg0: i32) -> (i32, i32) {
    %c0_i32 = arith.constant 0 : i32
    %c0_i32_0 = arith.constant 0 : i32
    %c0_i32_1 = arith.constant 0 : i32
    return %c0_i32, %c0_i32_0 : i32, i32
  }
  func.func @transform_12(%arg0: i32) -> (i32, i32) {
    %c0_i32 = arith.constant 0 : i32
    %c0_i32_0 = arith.constant 0 : i32
    %c0_i32_1 = arith.constant 0 : i32
    return %c0_i32, %c0_i32_0 : i32, i32
  }
  func.func @transform_13(%arg0: i32) -> (i32, i32) {
    %c0_i32 = arith.constant 0 : i32
    %c0_i32_0 = arith.constant 0 : i32
    %c0_i32_1 = arith.constant 0 : i32
    return %c0_i32, %c0_i32_0 : i32, i32
  }
  func.func @transform_14(%arg0: i32) -> (i32, i32, i32) {
    %c0_i32 = arith.constant 0 : i32
    %c0_i32_0 = arith.constant 0 : i32
    %c0_i32_1 = arith.constant 0 : i32
    return %arg0, %c0_i32, %c0_i32_0 : i32, i32, i32
  }
}

</mosaic_0001>

<bundles_post_ra>
// kernel: tpu_custom_call.1
= control target key start
LH: loop header
LB: loop body
LE: loop exit
PB: predicated region body
PF: predicated region fallthrough
CT: control target
= control target key end

     0   :  { %s3500_s0 = inlined_call_operand.hbm [shape: f32[1,512], index: 0, kind: input, shape index: {}]   ;;  %s3501_s1 = inlined_call_operand.vmem [shape: bf16[64,512], index: 1, kind: input, shape index: {}]   ;;  %s3502_s2 = inlined_call_operand.vmem [shape: bf16[64,512], index: 2, kind: input, shape index: {}]   ;;  %s3503_s3 = inlined_call_operand.hbm [shape: s32[2,128], index: 3, kind: input, shape index: {}]   ;;  %s3504_s4 = inlined_call_operand.hbm [shape: bf16[32,64], index: 4, kind: input, shape index: {}]   ;;  %s3505_s5 = inlined_call_operand.vmem [shape: f32[32,1], index: 5, kind: input, shape index: {}]   ;;  %s3506_s6 = inlined_call_operand.hbm [shape: bf16[32,32], index: 6, kind: input, shape index: {}]   ;;  %s3507_s7 = inlined_call_operand.vmem [shape: f32[32,1], index: 7, kind: input, shape index: {}]   ;;  %s3508_s8 = inlined_call_operand.vmem [shape: bf16[64,32], index: 8, kind: input, shape index: {}]   ;;  %s3509_s9 = inlined_call_operand.vmem [shape: f32[64,1], index: 9, kind: input, shape index: {}]   ;;  %s3510_s10 = inlined_call_operand.hbm [shape: bf16[64,64], index: 10, kind: input, shape index: {}]   ;;  %s3511_s11 = inlined_call_operand.vmem [shape: f32[64,1], index: 11, kind: input, shape index: {}]   ;;  %s3512_s12 = inlined_call_operand.vmem [shape: bf16[16,64], index: 12, kind: input, shape index: {}]   ;;  %s3513_s13 = inlined_call_operand.vmem [shape: f32[16,1], index: 13, kind: input, shape index: {}]   ;;  %s3514_s14 = inlined_call_operand.hbm [shape: f32[2,1,128], index: 14, kind: output, shape index: {}]  }
   0x1   :  { %3527 = sst [smem:[#allocation23_spill]] %s3503_s3 }
   0x2   :  { %3528 = sst [smem:[#allocation24_spill]] %s3504_s4 }
   0x3   :  { %3529 = sst [smem:[#allocation25_spill]] %s3506_s6 }
   0x4   :  { %3530 = sst [smem:[#allocation26_spill]] %s3510_s10 }
   0x5   :  { %3531 = sst [smem:[#allocation27_spill]] %s3514_s14 }
   0x6   :  { %19 = vsyncpa [#allocation3], 0 }
   0x7   :  { %21 = vsyncpa [#allocation3 + $0x1], 0 }
   0x8   :  { %22 = vsyncpa [#allocation8], 0 }
   0x9   :  { %23 = vsyncpa [#allocation11], 0 }
   0xa   :  { %24 = vsyncpa [#allocation4], 0 }
   0xb   :  { %26 = vsyncpa [#allocation4 + $0x1], 0  ;;  %s2843_s29 = smov 0   ;;  %s2845_s30 = smov 0  }
   0xc   :  { %s2847_s15 = smov 0   ;;  %s2849_s16 = smov 0  }
   0xd LB: > { %3532 = sst [smem:[#allocation18_spill]] %s2743_s29  ;;  %s2864_s17 = sadd.s32 4294967295, %s2755_s16   ;;  %s2755_s16 = sphi %s2849_s16, %s3561_s16   ;;  %s2751_s15 = sphi %s2847_s15, %s3565_s15   ;;  %s2747_s30 = sphi %s2845_s30, %s3564_s30   ;;  %s2743_s29 = sphi %s2843_s29, %s3563_s29  }
   0xe   : > { %s2214_s18 = sadd.s32 4294967294, %s2755_s16   ;;  %s2868_s19 = sadd.s32 1, %s2755_s16  }
   0xf   : > { %3533 = sst [smem:[#allocation19_spill]] %s2868_s19  ;;  %s39_s20 = sadd.s32 1, %s2751_s15 }
  0x10   : > { %s36_s21 = ssub.s32 %s2755_s16, %s2868_s19  ;;  %p46_p0 = scmp.ne.s32.totalorder %s2751_s15, %s2747_s30 }
  0x11   : > { %p37_p1 = scmp.eq.s32.totalorder %s36_s21, 0  ;;  %p47_p2 = scmp.eq.s32.totalorder %s2755_s16, 0 }
  0x12   : > { %p52_p3 = scmp.ne.s32.totalorder %s2747_s30, %s2743_s29  ;;  %p3518_p4 = scmp.eq.s32.totalorder %s2864_s17, 0 }
  0x13   : > { %s2880_s22 = scalar_select %p37_p1, %s2751_s15, %s39_s20  }
  0x14   : > { %p2882_p5 = por %p47_p2, %p46_p0  ;;  %p2888_p6 = por %p3518_p4, %p52_p3 }
  0x15   : > { %3534 = sst [smem:[#allocation20_spill]] %s2880_s22  ;;  %p359_p7 = scmp.eq.s32.totalorder %s2864_s17, 1 }
  0x16   : > { %s3535_s23 = scalar_select %p2882_p5, 1, 0 }
  0x17   : > { %s3536_s24 = scalar_select %p2888_p6, 1, 0 }
  0x18   : > { %p365_p8 = scmp.eq.s32.totalorder %s2214_s18, 1  ;;  %p2215_p9 = scmp.ge.s32.totalorder %s2755_s16, 1 }
  0x19   : > { %p372_p10 = scmp.lt.s32.totalorder %s2755_s16, 3  ;;  %p2895_p11 = por %p359_p7, %p46_p0 }
  0x1a   : > { %p2899_p12 = por %p365_p8, %p52_p3  ;;  %s2757_s28 = smov [#allocation7]  }
  0x1b   : > { %s3537_s25 = scalar_select %p2895_p11, 1, 0 }
  0x1c   : > { %s3539_s26 = scalar_select %p2899_p12, 1, 0 }
  0x1d   : > { %3538 = sst [smem:[#allocation21_spill]] %s3537_s25  ;;  %p2903_p13 = pnand %p2215_p9, %p372_p10 }
  0x1e   : > { %3540 = sst [smem:[#allocation22_spill]] %s3539_s26  ;;  %s385_s20 = sshll.u32 %s2757_s28, 4  ;;  %s386_s20 = int_to_ptr.vmem [resolvable:$true] %s385_s20 }
  0x1f   : > { %s3541_s27 = scalar_select %p2903_p13, 1, 0 }
  0x20   : > { %p2383_p1 = pneg %p2903_p13  ;;  %s2758_s21 = smov [#allocation10]  }
  0x21   : > { %s411_s22 = sshll.u32 %s2758_s21, 4  ;;  %s2564_s19 = scalar_lea.vmem %s386_s20, 32  ;;  %s412_s22 = int_to_ptr.vmem [resolvable:$true] %s411_s22 }
  0x22   : > { %p2911_p2 = pnand %p2383_p1, %p3518_p4  ;;  %p2565_p3 = scmp.ne.s32.totalorder %s386_s20, %s2564_s19 }
  0x23   : > { %p2572_p9 = scmp.lt.s32.totalorder %s386_s20, %s386_s20  ;;  %p2573_p10 = scmp.lt.s32.totalorder %s2564_s19, %s2564_s19 }
  0x24   : > { %p2555_p0 = pneg %p2911_p2 }
  0x25   : > { %p2574_p12 = por %p2573_p10, %p2572_p9 }
  0x26   : > { %p2567_p7 = pnand %p2565_p3, %p2555_p0 }
  0x28   : > { %p2568_p8 = pneg %p2567_p7 }
  0x2a   : > { %p2575_p1 = pnand %p2574_p12, %p2568_p8 }
  0x2c   : > { %2578 = shalt.err (!%p2575_p1)
}
  0x2d   : > { %s3543_s3 = sld [smem:[#allocation23_spill]]  ;;  %s2590_s21 = scalar_lea.vmem %s412_s22, 256 }
  0x2e   : > { %p2591_p4 = scmp.ne.s32.totalorder %s412_s22, %s2590_s21  ;;  %p2598_p3 = scmp.lt.s32.totalorder %s412_s22, %s412_s22 }
  0x2f   : > { %p2599_p7 = scmp.lt.s32.totalorder %s2590_s21, %s2590_s21 }
  0x30   : > { %p2593_p11 = pnand %p2591_p4, %p2555_p0 }
  0x31   : > { %p2600_p13 = por %p2599_p7, %p2598_p3 }
  0x32   : > { %p2594_p6 = pneg %p2593_p11 }
  0x33   : > { %2386 = dma.hbm_to_vmem [thread:$0]  (!%p2911_p2), %s3543_s3, 32, %s386_s20, [#allocation8]  }
  0x34   : > { %p2601_p5 = pnand %p2600_p13, %p2594_p6 }
  0x36   : > { %2604 = shalt.err (!%p2601_p5)
}
  0x37   : > { %s2759_s19 = smov 64   ;;  %s2760_s29 = smov 4  }
  0x38   : > { %s3544_s6 = sld [smem:[#allocation25_spill]]  ;;  %s2761_s28 = smov [#allocation9]  }
  0x39   : > { %s395_s3 = sshll.u32 %s2761_s28, 4  ;;  %s2762_s14 = smov [#allocation12]   ;;  %s396_s3 = int_to_ptr.vmem [resolvable:$true] %s395_s3 }
  0x3a   : > { %s433_s21 = sshll.u32 %s2762_s14, 4  ;;  %s2616_s25 = scalar_lea.vmem %s396_s3, 256  ;;  %s434_s21 = int_to_ptr.vmem [resolvable:$true] %s433_s21 }
  0x3b   : > { %p2617_p4 = scmp.ne.s32.totalorder %s396_s3, %s2616_s25  ;;  %p2624_p11 = scmp.lt.s32.totalorder %s396_s3, %s396_s3 }
  0x3c   : > { %p2625_p12 = scmp.lt.s32.totalorder %s2616_s25, %s2616_s25 }
  0x3d   : > { %p2619_p5 = pnand %p2617_p4, %p2555_p0 }
  0x3e   : > { %2392 = dma.hbm_to_vmem [thread:$0]  (!%p2911_p2), %s3544_s6, 256, %s412_s22, [#allocation11], %s2759_s19, %s2759_s19, %s2760_s29  }
  0x3f   : > { %p2620_p6 = pneg %p2619_p5  ;;  %p2626_p13 = por %p2625_p12, %p2624_p11 }
  0x41   : > { %p2627_p8 = pnand %p2626_p13, %p2620_p6 }
  0x43   : > { %2630 = shalt.err (!%p2627_p8)
}
  0x44   : > { %s3545_s4 = sld [smem:[#allocation24_spill]]  ;;  %s2642_s14 = scalar_lea.vmem %s434_s21, 512 }
  0x45   : > { %p2643_p9 = scmp.ne.s32.totalorder %s434_s21, %s2642_s14  ;;  %p2650_p3 = scmp.lt.s32.totalorder %s434_s21, %s434_s21 }
  0x46   : > { %p2651_p7 = scmp.lt.s32.totalorder %s2642_s14, %s2642_s14 }
  0x47   : > { %p2645_p10 = pnand %p2643_p9, %p2555_p0 }
  0x48   : > { %p2652_p4 = por %p2651_p7, %p2650_p3 }
  0x49   : > { %p2646_p1 = pneg %p2645_p10 }
  0x4a   : > { %2389 = dma.hbm_to_vmem [thread:$0]  (!%p2911_p2), %s3545_s4, 256, %s396_s3, [#allocation8], %s2759_s19, %s2759_s19, %s2760_s29  }
  0x4b   : > { %p2653_p5 = pnand %p2652_p4, %p2646_p1 }
  0x4d   : > { %2656 = shalt.err (!%p2653_p5)
}
  0x4e   : > { %s3546_s10 = sld [smem:[#allocation26_spill]]  ;;  %p2220_p6 = scmp.ge.s32.totalorder %s2755_s16, 2 }
  0x4f   : > { %s2962_s3 = sand.u32 (!%p2220_p6), 1, %s2751_s15   ;;  %s2325_s18 = sshll.u32 (!%p2220_p6), %s2755_s16, 5 }
  0x50   : > { %452 = sbr.rel (%p2220_p6) target bundleno = 122 (0x7a), region = 60  ;;  %s2221_s28 = sshll.u32 (!%p2220_p6), %s2962_s3, 1 }
  0x51   : > { %s2969_s14 = scalar_lea.hbm (!%p2220_p6), %s3500_s0, %s2325_s18  ;;  %p3547_p0 = scmp.ne.s32.totalorder (!%p2220_p6), %s3535_s23, 0 }
  0x52   : > { %s2657_s25 = scalar_lea.hbm (!%p2220_p6), %s2969_s14, 32  ;;  %s2661_s6 = scalar_lea.hbm (!%p2220_p6), %s3500_s0, 64 }
  0x53   : > { %p2662_p13 = scmp.lt.s32.totalorder (!%p2220_p6), %s2969_s14, %s3500_s0  ;;  %p2663_p8 = scmp.lt.s32.totalorder (!%p2220_p6), %s2661_s6, %s2657_s25 }
  0x54   : > { %2395 = dma.hbm_to_vmem [thread:$0]  (!%p2911_p2), %s3546_s10, 512, %s434_s21, [#allocation11], %s2759_s19, %s2759_s19, %s2760_s29  }
  0x55   : > { %s460_s29 = scalar_lea.vmem [#allocation2], %s2221_s28  ;;  %s457_s21 = scalar_lea.sflag [#allocation3], %s2962_s3 }
  0x56   : > { %s468_s19 = sshll.u32 %s460_s29, 4  ;;  %p2658_p2 = scmp.ne.s32.totalorder %s2969_s14, %s2657_s25  ;;  %s469_s19 = int_to_ptr.vmem [resolvable:$true] %s468_s19 }
  0x57   : > { %p2664_p9 = por %p2663_p8, %p2662_p13 }
  0x58   : > { %p2659_p11 = pnand %p2658_p2, %p3547_p0 }
  0x5a   : > { %p2660_p12 = pneg %p2659_p11 }
  0x5c   : > { %p2665_p10 = pnand %p2664_p9, %p2660_p12 }
  0x5e   : > { %2668 = shalt.err (!%p2665_p10)
}
  0x5f   : > { %s2669_s18 = scalar_lea.vmem %s469_s19, 32  ;;  %s2763_s28 = smov [#allocation2]  }
  0x60   : > { %p2670_p1 = scmp.ne.s32.totalorder %s469_s19, %s2669_s18  ;;  %s2673_s26 = sshll.u32 %s2763_s28, 4  ;;  %s2674_s26 = int_to_ptr.vmem [resolvable:$false] %s2673_s26 }
  0x61   : > { %s2675_s29 = scalar_lea.vmem %s2674_s26, 64  ;;  %p2676_p4 = scmp.lt.s32.totalorder %s469_s19, %s2674_s26 }
  0x62   : > { %p2671_p3 = pnand %p2670_p1, %p3547_p0  ;;  %p2677_p5 = scmp.lt.s32.totalorder %s2675_s29, %s2669_s18 }
  0x64   : > { %p2672_p7 = pneg %p2671_p3  ;;  %p2678_p2 = por %p2677_p5, %p2676_p4 }
  0x66   : > { %p2679_p11 = pnand %p2678_p2, %p2672_p7 }
  0x68   : > { %2682 = shalt.err (!%p2679_p11)
}
  0x69   : > { %2371 = dma.hbm_to_vmem [thread:$0]  (%p3547_p0), %s2969_s14, 32, %s469_s19, %s457_s21  }
  0x6a   : > { %474 = sbr.rel (!%p3547_p0) target bundleno = 114 (0x72), region = 68  ;;  %s2224_s4 = sshll.u32 (%p3547_p0), %s2962_s3, 6 }
  0x6b   : > { %s2326_s6 = sshll.u32 (%p3547_p0), %s2755_s16, 3  ;;  %s478_s22 = scalar_lea.vmem (%p3547_p0), [#allocation5], %s2224_s4 }
  0x6c   : > { %s481_s20 = scalar_lea.vmem (%p3547_p0), %s3501_s1, %s2326_s6 }
  0x6d   : > { %v524_v0 = vld [vmem:[%s481_s20] sm:$0xff] (%p3547_p0)  ;;  %v526_v1 = vld [vmem:[%s481_s20 + $0x10] sm:$0xff] (%p3547_p0) }
  0x6e   : > { %v528_v2 = vld [vmem:[%s481_s20 + $0x20] sm:$0xff] (%p3547_p0)  ;;  %525 = vst [vmem:[%s478_s22] sm:$0xff] (%p3547_p0), %v524_v0  ;;  %527 = vst [vmem:[%s478_s22 + $0x8] sm:$0xff] (%p3547_p0), %v526_v1  ;;  %v530_v3 = vld [vmem:[%s481_s20 + $0x30] sm:$0xff] (%p3547_p0) }
  0x6f   : > { %529 = vst [vmem:[%s478_s22 + $0x10] sm:$0xff] %v528_v2  ;;  %v532_v4 = vld [vmem:[%s481_s20 + $0x40] sm:$0xff]  ;;  %v534_v5 = vld [vmem:[%s481_s20 + $0x50] sm:$0xff]  ;;  %531 = vst [vmem:[%s478_s22 + $0x18] sm:$0xff] %v530_v3 }
  0x70   : > { %533 = vst [vmem:[%s478_s22 + $0x20] sm:$0xff] %v532_v4  ;;  %535 = vst [vmem:[%s478_s22 + $0x28] sm:$0xff] %v534_v5  ;;  %v536_v6 = vld [vmem:[%s481_s20 + $0x60] sm:$0xff]  ;;  %v538_v7 = vld [vmem:[%s481_s20 + $0x70] sm:$0xff] }
  0x71   : > { %537 = vst [vmem:[%s478_s22 + $0x30] sm:$0xff] %v536_v6  ;;  %539 = vst [vmem:[%s478_s22 + $0x38] sm:$0xff] %v538_v7 }
  0x72 PF: > { %p3548_p0 = scmp.ne.s32.totalorder %s3535_s23, 0 }
  0x73   : > { %s2227_s14 = sshll.u32 (%p3548_p0), %s2962_s3, 6  ;;  %s2327_s19 = sshll.u32 (%p3548_p0), %s2755_s16, 3 }
  0x74   : > { %545 = sbr.rel (!%p3548_p0) target bundleno = 122 (0x7a), region = 106  ;;  %s552_s28 = scalar_lea.vmem (%p3548_p0), %s3502_s2, %s2327_s19 }
  0x75   : > { %v595_v8 = vld [vmem:[%s552_s28] sm:$0xff] (%p3548_p0)  ;;  %v597_v9 = vld [vmem:[%s552_s28 + $0x10] sm:$0xff] (%p3548_p0)  ;;  %s549_s26 = scalar_lea.vmem (%p3548_p0), [#allocation6], %s2227_s14 }
  0x76   : > { %v599_v10 = vld [vmem:[%s552_s28 + $0x20] sm:$0xff] (%p3548_p0)  ;;  %596 = vst [vmem:[%s549_s26] sm:$0xff] (%p3548_p0), %v595_v8  ;;  %598 = vst [vmem:[%s549_s26 + $0x8] sm:$0xff] (%p3548_p0), %v597_v9  ;;  %v601_v11 = vld [vmem:[%s552_s28 + $0x30] sm:$0xff] (%p3548_p0) }
  0x77   : > { %600 = vst [vmem:[%s549_s26 + $0x10] sm:$0xff] (%p3548_p0), %v599_v10  ;;  %v603_v12 = vld [vmem:[%s552_s28 + $0x40] sm:$0xff] (%p3548_p0)  ;;  %v605_v13 = vld [vmem:[%s552_s28 + $0x50] sm:$0xff] (%p3548_p0)  ;;  %602 = vst [vmem:[%s549_s26 + $0x18] sm:$0xff] (%p3548_p0), %v601_v11 }
  0x78   : > { %604 = vst [vmem:[%s549_s26 + $0x20] sm:$0xff] (%p3548_p0), %v603_v12  ;;  %606 = vst [vmem:[%s549_s26 + $0x28] sm:$0xff] (%p3548_p0), %v605_v13  ;;  %v607_v14 = vld [vmem:[%s552_s28 + $0x60] sm:$0xff] (%p3548_p0)  ;;  %v609_v15 = vld [vmem:[%s552_s28 + $0x70] sm:$0xff] (%p3548_p0) }
  0x79   : > { %608 = vst [vmem:[%s549_s26 + $0x30] sm:$0xff] %v607_v14  ;;  %610 = vst [vmem:[%s549_s26 + $0x38] sm:$0xff] %v609_v15 }
  0x7a PF: > { %p3549_p12 = scmp.ne.s32.totalorder %s3541_s27, 0 }
  0x7b   : > { %s3005_s23 = sand.u32 (!%p3549_p12), 1, %s2747_s30   ;;  %p3550_p13 = scmp.ne.s32.totalorder (!%p3549_p12), %s3536_s24, 0 }
  0x7c   : > { %619 = sbr.rel (%p3549_p12) target bundleno = 1863 (0x747), region = 144  ;;  %s2231_s3 = sshll.u32 (!%p3549_p12), %s3005_s23, 1 }
  0x7d   : > { %s622_s29 = scalar_lea.sflag (!%p3549_p12), [#allocation3], %s3005_s23  ;;  %s3009_s4 = scalar_lea.vmem (!%p3549_p12), [#allocation2], %s2231_s3 }
  0x81   : > { %2726 = dma.done.wait (%p3550_p13), %s622_s29, 32  }
  0x82   : > { %2728 = vsyncadd (%p3550_p13), %s622_s29, 4294967264  ;;  %s2232_s6 = sshll.u32 %s3005_s23, 6  ;;  %p3551_p8 = scmp.eq.s32.totalorder %s2864_s17, 0 }
  0x83   : > { %s633_s27 = scalar_lea.vmem [#allocation5], %s2232_s6  ;;  %s3016_s10 = scalar_lea.vmem [#allocation6], %s2232_s6 }
  0x84   : > { %2730 = dma.done.wait (%p3551_p8), [#allocation8], 288   ;;  %p3552_p9 = pmov %p3551_p8 }
  0x85   : > { %p3553_p10 = pmov %p3551_p8 }
  0x86   : > { %2732 = vsyncadd (%p3552_p9), [#allocation8], 4294967008 }
  0x87   : > { %2734 = dma.done.wait (%p3553_p10), [#allocation11], 768   ;;  %p3554_p1 = pmov %p3551_p8 }
  0x88   : > { %v2764_v16 = vmov 0   ;;  %v2452_v17 = vld [vmem:[%s633_s27 + $0x34] ss:$8 sps:$4 sm:$0xff]   ;;  %v2454_v18 = vld [vmem:[%s633_s27 + $0x30] ss:$8 sps:$4 sm:$0xff]   ;;  %v724_v27 = vld [vmem:[%s3505_s5 + $0x8] sm:$0xff] }
  0x89   : > { %2736 = vsyncadd (%p3554_p1), [#allocation11], 4294966528  ;;  %836 = vmatprep.mubr.bf16.mxu0 %v2764_v16  ;;  %2450 = vset.pattern.permute.xlu0 %v2764_v16  ;;  %v2455_v19 = vld [vmem:[%s633_s27 + $0x24] ss:$8 sps:$4 sm:$0xff]   ;;  %v2457_v20 = vld [vmem:[%s633_s27 + $0x20] ss:$8 sps:$4 sm:$0xff]  }
  0x8a   : > { %2451 = vset.pattern.permute.xlu1 %v2764_v16  ;;  %942 = vmatprep.mubr.bf16.mxu1 %v2764_v16  ;;  %v2458_v21 = vld [vmem:[%s633_s27 + $0x14] ss:$8 sps:$4 sm:$0xff]   ;;  %v2460_v22 = vld [vmem:[%s633_s27 + $0x10] ss:$8 sps:$4 sm:$0xff]   ;;  %v2461_v24 = vld [vmem:[%s633_s27 + $0x4] ss:$8 sps:$4 sm:$0xff]  }
  0x8b   : > { %812 = vmatprep.subr.bf16.mxu0 %v2452_v17  ;;  %v725_v23 = vld [vmem:[%s3505_s5 + $0x10] sm:$0xff]  ;;  %v723_v25 = vld [vmem:[%s3505_s5] sm:$0xff]  ;;  %v726_v26 = vld [vmem:[%s3505_s5 + $0x18] sm:$0xff]  ;;  %vm797_vm0 = vcmask 523264   ;;  %vm903_vm1 = vcmask 261120   ;;  %s2287_s19 = sshll.u32 %s2864_s17, 8 }
  0x8c   : > { %813 = vmatpush1.bf16.msra.mxu0 %v2454_v18  ;;  %739 = vperm.xlu0 %2450, %v725_v23   ;;  %v2463_v28 = vld [vmem:[%s633_s27] ss:$8 sps:$4 sm:$0xff]   ;;  %v871_v29 = vld [vmem:[%s3507_s7 + $0x10] sm:$0xff]  ;;  %v872_v31 = vld [vmem:[%s3507_s7 + $0x18] sm:$0xff]  ;;  %s2322_s21 = sshll.u32 %s2864_s17, 4  ;;  %s706_s18 = scalar_lea.vmem [#allocation13], %s3005_s23 }
  0x8d   : > { %814 = vmatprep.subr.bf16.mxu0 %v2455_v19  ;;  %729 = vperm.xlu1 %2451, %v723_v25   ;;  %v3045_v30 = vld [vmem:[#allocation9] sm:$0xff]   ;;  %v1159_v34 = vld [vmem:[%s3509_s9 + $0x30] sm:$0xff]  ;;  %v1160_v36 = vld [vmem:[%s3509_s9 + $0x38] sm:$0xff]  ;;  %s2074_s28 = sshll.u32 %s706_s18, 4  ;;  %s3556_s3 = sld [smem:[#allocation27_spill]]  ;;  %s2075_s28 = int_to_ptr.vmem [resolvable:$true] %s2074_s28 }
  0x8e   : > { %v869_v32 = vld [vmem:[%s3507_s7] sm:$0xff]  ;;  %v870_v33 = vld [vmem:[%s3507_s7 + $0x8] sm:$0xff]  ;;  %v1155_v39 = vld [vmem:[%s3509_s9 + $0x10] sm:$0xff]  ;;  %s2062_s6 = scalar_lea.sflag [#allocation4], %s3005_s23  ;;  %s2683_s24 = scalar_lea.vmem %s2075_s28, 16 }
  0x8f   : > { %v3062_v35 = vld [vmem:[#allocation9 + $0x8] sm:$0xff]   ;;  %v1157_v37 = vld [vmem:[%s3509_s9 + $0x20] sm:$0xff]  ;;  %v1156_v40 = vld [vmem:[%s3509_s9 + $0x18] sm:$0xff]  ;;  %p2684_p3 = scmp.ne.s32.totalorder %s2075_s28, %s2683_s24  ;;  %s2767_s27 = smov [#allocation13]  }
  0x90   : > { %815 = vmatpush1.bf16.msra.mxu0 %v2457_v20  ;;  %744 = vperm.xlu0 %2450, %v726_v26   ;;  %v1158_v38 = vld [vmem:[%s3509_s9 + $0x28] sm:$0xff]  ;;  %v1153_v41 = vld [vmem:[%s3509_s9] sm:$0xff]  ;;  %v1336_v43 = vld [vmem:[%s3511_s11 + $0x30] sm:$0xff]  ;;  %s2687_s25 = sshll.u32 %s2767_s27, 4  ;;  %s2688_s25 = int_to_ptr.vmem [resolvable:$false] %s2687_s25 }
  0x91   : > { %816 = vmatprep.subr.bf16.mxu0 %v2458_v21  ;;  %734 = vperm.xlu1 %2451, %v724_v27   ;;  %v1154_v42 = vld [vmem:[%s3509_s9 + $0x8] sm:$0xff]  ;;  %v1337_v44 = vld [vmem:[%s3511_s11 + $0x38] sm:$0xff]  ;;  %v1334_v45 = vld [vmem:[%s3511_s11 + $0x20] sm:$0xff]  ;;  %s2689_s17 = scalar_lea.vmem %s2688_s25, 32  ;;  %p2690_p2 = scmp.lt.s32.totalorder %s2075_s28, %s2688_s25 }
  0x92   : > { %v1335_v46 = vld [vmem:[%s3511_s11 + $0x28] sm:$0xff]  ;;  %v1332_v47 = vld [vmem:[%s3511_s11 + $0x10] sm:$0xff]  ;;  %v1333_v48 = vld [vmem:[%s3511_s11 + $0x18] sm:$0xff]  ;;  %p2691_p11 = scmp.lt.s32.totalorder %s2689_s17, %s2683_s24 }
  0x93   : > { %v1330_v49 = vld [vmem:[%s3511_s11] sm:$0xff]  ;;  %v1331_v50 = vld [vmem:[%s3511_s11 + $0x8] sm:$0xff]  ;;  %v3135_v19 = vld [vmem:[#allocation10] sm:$0xff]   ;;  %s2072_s29 = scalar_lea.hbm %s3556_s3, %s2322_s21 }
  0x94   : > { %817 = vmatpush1.bf16.msra.mxu0 %v2460_v22  ;;  %885 = vperm.xlu0 %2450, %v871_v29   ;;  %v1501_v51 = vld [vmem:[%s3513_s13] sm:$0xff]  ;;  %v1502_v52 = vld [vmem:[%s3513_s13 + $0x8] sm:$0xff]  ;;  %v2467_v20 = vld [vmem:[%s3016_s10 + $0x30] ss:$8 sps:$4 sm:$0xff]   ;;  %p2692_p0 = por %p2691_p11, %p2690_p2 }
  0x95   : > { %818 = vmatprep.subr.bf16.mxu0 %v2461_v24  ;;  %890 = vperm.xlu1 %2451, %v872_v31   ;;  %v2469_v17 = vld [vmem:[%s3016_s10 + $0x34] ss:$8 sps:$4 sm:$0xff]   ;;  %v2472_v21 = vld [vmem:[%s3016_s10 + $0x24] ss:$8 sps:$4 sm:$0xff]   ;;  %v2470_v22 = vld [vmem:[%s3016_s10 + $0x20] ss:$8 sps:$4 sm:$0xff]  }
  0x96   : > { %v2476_v23 = vld [vmem:[%s3016_s10 + $0x14] ss:$8 sps:$4 sm:$0xff]   ;;  %v2474_v25 = vld [vmem:[%s3016_s10 + $0x10] ss:$8 sps:$4 sm:$0xff]   ;;  %v2479_v26 = vld [vmem:[%s3016_s10 + $0x4] ss:$8 sps:$4 sm:$0xff]  }
  0x97   : > { %v3144_v24 = vld [vmem:[#allocation10 + $0x8] sm:$0xff]  }
  0x98   : > { %819 = vmatpush1.bf16.msra.mxu0 %v2463_v28  ;;  %875 = vperm.xlu0 %2450, %v869_v32   ;;  %v2477_v27 = vld [vmem:[%s3016_s10] ss:$8 sps:$4 sm:$0xff]  }
  0x99   : > { %880 = vperm.xlu1 %2451, %v870_v33  }
  0x9b   : > { %2248 = vmatmul.mubr.msk.bf16.vlgmr.msra.gmra.mxu0 %vm797_vm0, %v3045_v30 }
  0x9c   : > { %846 = vmatprep.mubr.bf16.mxu0 %v2764_v16  ;;  %1193 = vperm.xlu0 %2450, %v1159_v34  }
  0x9d   : > { %1198 = vperm.xlu1 %2451, %v1160_v36  }
  0xa0   : > { %1183 = vperm.xlu0 %2450, %v1157_v37  }
  0xa1   : > { %1188 = vperm.xlu1 %2451, %v1158_v38  }
  0xa3   : > { %2249 = vmatmul.mubr.msk.bf16.gmra.mxu0 %vm797_vm0, %v3062_v35 }
  0xa4   : > { %1112 = vmatprep.mubr.bf16.mxu0 %v2764_v16  ;;  %1173 = vperm.xlu0 %2450, %v1155_v39  }
  0xa5   : > { %1178 = vperm.xlu1 %2451, %v1156_v40  }
  0xa8   : > { %1163 = vperm.xlu0 %2450, %v1153_v41  }
  0xa9   : > { %1168 = vperm.xlu1 %2451, %v1154_v42  }
  0xac   : > { %1370 = vperm.xlu0 %2450, %v1336_v43  }
  0xad   : > { %1375 = vperm.xlu1 %2451, %v1337_v44  }
  0xb0   : > { %1360 = vperm.xlu0 %2450, %v1334_v45  }
  0xb1   : > { %1365 = vperm.xlu1 %2451, %v1335_v46  }
  0xb4   : > { %1350 = vperm.xlu0 %2450, %v1332_v47  }
  0xb5   : > { %1355 = vperm.xlu1 %2451, %v1333_v48  }
  0xb8   : > { %1340 = vperm.xlu0 %2450, %v1330_v49  }
  0xb9   : > { %1345 = vperm.xlu1 %2451, %v1331_v50  }
  0xbc   : > { %1505 = vperm.xlu0 %2450, %v1501_v51  }
  0xbd   : > { %1510 = vperm.xlu1 %2451, %v1502_v52  }
 0x107   : > { %v3118_v56 = vpop.permute.xlu0 %739 }
 0x108   : > { %v3120_v57 = vpop.permute.xlu1 %729 }
 0x10b   : > { %v3122_v61 = vpop.permute.xlu0 %744 }
 0x10c   : > { %v3124_v62 = vpop.permute.xlu1 %734 }
 0x10f   : > { %v3158_v28 = vpop.permute.xlu0 %885 }
 0x110   : > { %v3160_v29 = vpop.permute.xlu1 %890 }
 0x113   : > { %v3162_v33 = vpop.permute.xlu0 %875 }
 0x114   : > { %v3164_v34 = vpop.permute.xlu1 %880 }
 0x15b   : > { %v838_v53 = vpop.f32.mrf.mxu0 }
 0x15c   : > { %v839_v11 = vadd.f32 %v838_v53, %v3120_v57 }
 0x15d   : > { %v840_v54 = vpop.f32.mrf.mxu0 }
 0x15e   : > { %v841_v4 = vadd.f32 %v840_v54, %v3120_v57 }
 0x15f   : > { %v842_v55 = vpop.f32.mrf.mxu0 }
 0x160   : > { %v843_v7 = vadd.f32 %v842_v55, %v3124_v62 }
 0x161   : > { %v844_v58 = vpop.f32.mrf.mxu0 }
 0x162   : > { %v845_v0 = vadd.f32 %v844_v58, %v3124_v62  ;;  %v857_v12 = vpack.c.bf16 %v843_v7, %v839_v11 }
 0x163   : > { %v848_v59 = vpop.f32.mrf.mxu0 }
 0x164   : > { %v849_v2 = vadd.f32 %v848_v59, %v3118_v56  ;;  %v858_v9 = vpack.c.bf16 %v845_v0, %v841_v4 }
 0x165   : > { %v850_v60 = vpop.f32.mrf.mxu0 }
 0x166   : > { %v851_v5 = vadd.f32 %v850_v60, %v3118_v56 }
 0x167   : > { %v852_v63 = vpop.f32.mrf.mxu0 }
 0x168   : > { %v853_v1 = vadd.f32 %v852_v63, %v3122_v61 }
 0x169   : > { %v854_v3 = vpop.f32.mrf.mxu0 }
 0x16a   : > { %v855_v6 = vadd.f32 %v854_v3, %v3122_v61  ;;  %v859_v8 = vpack.c.bf16 %v853_v1, %v849_v2 }
 0x16c   : > { %v860_v10 = vpack.c.bf16 %v855_v6, %v851_v5 }
 0x16e   : > { %2489 = vtanh.bf16 %v860_v10 }
 0x16f   : > { %2491 = vtanh.bf16 %v859_v8 }
 0x170   : > { %2493 = vtanh.bf16 %v858_v9 }
 0x171   : > { %2495 = vtanh.bf16 %v857_v12 }
 0x17c   : > { %v2490_v13 = vpop.eup %2489 }
 0x17d   : > { %v2492_v14 = vpop.eup %2491  ;;  %922 = vmatprep.subr.bf16.mxu1 %v2490_v13 }
 0x17e   : > { %v2494_v15 = vpop.eup %2493  ;;  %923 = vmatpush1.bf16.msra.mxu1 %v2492_v14 }
 0x17f   : > { %924 = vmatprep.subr.bf16.mxu1 %v2494_v15  ;;  %v2496_v18 = vpop.eup %2495 }
 0x182   : > { %925 = vmatpush1.bf16.msra.mxu1 %v2496_v18 }
 0x183   : > { %1027 = vmatprep.subr.bf16.mxu1 %v2469_v17 }
 0x185   : > { %2252 = vmatmul.mubr.msk.bf16.vlgmr.msra.gmra.mxu1 %vm903_vm1, %v3135_v19 }
 0x186   : > { %1028 = vmatpush1.bf16.msra.mxu1 %v2467_v20  ;;  %952 = vmatprep.mubr.bf16.mxu1 %v2764_v16 }
 0x187   : > { %1029 = vmatprep.subr.bf16.mxu1 %v2472_v21 }
 0x18a   : > { %1030 = vmatpush1.bf16.msra.mxu1 %v2470_v22 }
 0x18b   : > { %1031 = vmatprep.subr.bf16.mxu1 %v2476_v23 }
 0x18d   : > { %2253 = vmatmul.mubr.msk.bf16.gmra.mxu1 %vm903_vm1, %v3144_v24 }
 0x18e   : > { %1032 = vmatpush1.bf16.msra.mxu1 %v2474_v25  ;;  %1051 = vmatprep.mubr.bf16.mxu1 %v2764_v16 }
 0x18f   : > { %1033 = vmatprep.subr.bf16.mxu1 %v2479_v26 }
 0x192   : > { %1034 = vmatpush1.bf16.msra.mxu1 %v2477_v27 }
 0x195   : > { %2262 = vmatmul.mubr.msk.bf16.vlgmr.msra.gmra.mxu1 %vm797_vm0, %v3045_v30 }
 0x196   : > { %1061 = vmatprep.mubr.bf16.mxu1 %v2764_v16 }
 0x19d   : > { %2263 = vmatmul.mubr.msk.bf16.gmra.mxu1 %vm797_vm0, %v3062_v35 }
 0x19e   : > { %1265 = vmatprep.mubr.bf16.mxu1 %v2764_v16 }
 0x245   : > { %v944_v31 = vpop.f32.mrf.mxu1 }
 0x246   : > { %v3167_v30 = vadd.f32 %v944_v31, %v3162_v33 }
 0x247   : > { %v946_v32 = vpop.f32.mrf.mxu1 }
 0x248   : > { %v3173_v38 = vadd.f32 %v946_v32, %v3162_v33 }
 0x249   : > { %v948_v36 = vpop.f32.mrf.mxu1 }
 0x24a   : > { %v3170_v37 = vadd.f32 %v948_v36, %v3164_v34 }
 0x24b   : > { %v950_v35 = vpop.f32.mrf.mxu1 }
 0x24c   : > { %v963_v39 = vpack.c.bf16 %v3170_v37, %v3167_v30  ;;  %v3178_v40 = vadd.f32 %v950_v35, %v3164_v34  ;;  %v2480_v30 = vld [vmem:[%s3508_s8] sm:$0xff]   ;;  %v2481_v37 = vld [vmem:[%s3508_s8 + $0x8] sm:$0xff]  }
 0x24d   : > { %v954_v41 = vpop.f32.mrf.mxu1 }
 0x24e   : > { %v964_v42 = vpack.c.bf16 %v3178_v40, %v3173_v38  ;;  %v3183_v45 = vadd.f32 %v954_v41, %v3158_v28  ;;  %v2483_v40 = vld [vmem:[%s3508_s8 + $0x18] sm:$0xff]  }
 0x24f   : > { %v956_v43 = vpop.f32.mrf.mxu1 }
 0x250   : > { %v957_v48 = vadd.f32 %v956_v43, %v3158_v28 }
 0x251   : > { %v958_v44 = vpop.f32.mrf.mxu1 }
 0x252   : > { %v3186_v46 = vadd.f32 %v958_v44, %v3160_v29 }
 0x253   : > { %v960_v47 = vpop.f32.mrf.mxu1 }
 0x254   : > { %v965_v49 = vpack.c.bf16 %v3186_v46, %v3183_v45  ;;  %v961_v50 = vadd.f32 %v960_v47, %v3160_v29 }
 0x255   : > { %v1053_v51 = vpop.f32.mrf.mxu1 }
 0x256   : > { %v966_v52 = vpack.c.bf16 %v961_v50, %v957_v48  ;;  %v1054_v10 = vadd.f32 %v1053_v51, %v3120_v57 }
 0x257   : > { %v1055_v53 = vpop.f32.mrf.mxu1 }
 0x258   : > { %v1056_v3 = vadd.f32 %v1055_v53, %v3120_v57 }
 0x259   : > { %v1057_v54 = vpop.f32.mrf.mxu1 }
 0x25a   : > { %v1058_v6 = vadd.f32 %v1057_v54, %v3124_v62 }
 0x25b   : > { %v1059_v55 = vpop.f32.mrf.mxu1 }
 0x25c   : > { %v1060_v63 = vadd.f32 %v1059_v55, %v3124_v62  ;;  %v1072_v11 = vpack.c.bf16 %v1058_v6, %v1054_v10 }
 0x25d   : > { %v1063_v58 = vpop.f32.mrf.mxu1 }
 0x25e   : > { %v1064_v1 = vadd.f32 %v1063_v58, %v3118_v56  ;;  %v1073_v8 = vpack.c.bf16 %v1060_v63, %v1056_v3 }
 0x25f   : > { %v1065_v59 = vpop.f32.mrf.mxu1 }
 0x260   : > { %v1066_v4 = vadd.f32 %v1065_v59, %v3118_v56 }
 0x261   : > { %v1067_v60 = vpop.f32.mrf.mxu1 }
 0x262   : > { %v1068_v0 = vadd.f32 %v1067_v60, %v3122_v61  ;;  %v1199_v60 = vpop.permute.xlu1 %1198 }
 0x263   : > { %v1069_v2 = vpop.f32.mrf.mxu1 }
 0x264   : > { %v1070_v5 = vadd.f32 %v1069_v2, %v3122_v61  ;;  %v1074_v7 = vpack.c.bf16 %v1068_v0, %v1064_v1  ;;  %v1194_v0 = vpop.permute.xlu0 %1193 }
 0x266   : > { %v1075_v9 = vpack.c.bf16 %v1070_v5, %v1066_v4  ;;  %v1189_v3 = vpop.permute.xlu1 %1188 }
 0x268   : > { %2497 = vtanh.bf16 %v1075_v9  ;;  %v1184_v5 = vpop.permute.xlu0 %1183 }
 0x269   : > { %2499 = vtanh.bf16 %v1074_v7 }
 0x26a   : > { %2501 = vtanh.bf16 %v1073_v8  ;;  %v1179_v10 = vpop.permute.xlu1 %1178 }
 0x26b   : > { %2503 = vtanh.bf16 %v1072_v11 }
 0x26c   : > { %2505 = vtanh.bf16 %v966_v52 }
 0x276   : > { %v2498_v12 = vpop.eup %2497 }
 0x277   : > { %v2500_v13 = vpop.eup %2499  ;;  %1092 = vmatprep.subr.bf16.mxu0 %v2498_v12 }
 0x278   : > { %v2502_v14 = vpop.eup %2501  ;;  %1093 = vmatpush1.bf16.msra.mxu0 %v2500_v13 }
 0x279   : > { %1094 = vmatprep.subr.bf16.mxu0 %v2502_v14  ;;  %v2504_v56 = vpop.eup %2503 }
 0x27c   : > { %1095 = vmatpush1.bf16.msra.mxu0 %v2504_v56 }
 0x27f   : > { %2264 = vmatmul.mubr.msk.bf16.vlgmr.msra.gmra.mxu0 %vm903_vm1, %v3135_v19 }
 0x280   : > { %1122 = vmatprep.mubr.bf16.mxu0 %v2764_v16 }
 0x287   : > { %2265 = vmatmul.mubr.msk.bf16.gmra.mxu0 %vm903_vm1, %v3144_v24 }
 0x288   : > { %1442 = vmatprep.mubr.bf16.mxu0 %v2764_v16 }
 0x33f   : > { %v1114_v57 = vpop.f32.mrf.mxu0 }
 0x340   : > { %v1115_v36 = vadd.f32 %v1114_v57, %v3162_v33  ;;  %v1174_v57 = vpop.permute.xlu0 %1173 }
 0x341   : > { %v1116_v61 = vpop.f32.mrf.mxu0 }
 0x342   : > { %v1117_v21 = vadd.f32 %v1116_v61, %v3162_v33 }
 0x343   : > { %v1118_v62 = vpop.f32.mrf.mxu0 }
 0x344   : > { %v1119_v24 = vadd.f32 %v1118_v62, %v3164_v34 }
 0x345   : > { %v1120_v15 = vpop.f32.mrf.mxu0 }
 0x346   : > { %v1121_v18 = vadd.f32 %v1120_v15, %v3164_v34  ;;  %v1133_v41 = vpack.c.bf16 %v1119_v24, %v1115_v36 }
 0x347   : > { %v1124_v17 = vpop.f32.mrf.mxu0 }
 0x348   : > { %v1134_v23 = vpack.c.bf16 %v1121_v18, %v1117_v21  ;;  %v1125_v19 = vadd.f32 %v1124_v17, %v3158_v28 }
 0x349   : > { %v1126_v20 = vpop.f32.mrf.mxu0 }
 0x34a   : > { %v1127_v27 = vadd.f32 %v1126_v20, %v3158_v28  ;;  %2507 = vtanh.bf16 %v1134_v23  ;;  %v2506_v28 = vpop.eup %2505 }
 0x34b   : > { %v1128_v22 = vpop.f32.mrf.mxu0 }
 0x34c   : > { %v1129_v25 = vadd.f32 %v1128_v22, %v3160_v29  ;;  %v1169_v22 = vpop.permute.xlu1 %1168 }
 0x34d   : > { %v1130_v26 = vpop.f32.mrf.mxu0 }
 0x34e   : > { %v1135_v31 = vpack.c.bf16 %v1129_v25, %v1125_v19  ;;  %v1131_v32 = vadd.f32 %v1130_v26, %v3160_v29  ;;  %v1164_v26 = vpop.permute.xlu0 %1163 }
 0x350   : > { %v1136_v35 = vpack.c.bf16 %v1131_v32, %v1127_v27  ;;  %2509 = vtanh.bf16 %v1135_v31 }
 0x352   : > { %2511 = vtanh.bf16 %v1136_v35 }
 0x353   : > { %2513 = vtanh.bf16 %v965_v49 }
 0x354   : > { %2515 = vtanh.bf16 %v964_v42 }
 0x355   : > { %2517 = vtanh.bf16 %v1133_v41 }
 0x356   : > { %2519 = vtanh.bf16 %v963_v39  ;;  %v2482_v39 = vld [vmem:[%s3508_s8 + $0x10] sm:$0xff]  }
 0x358   : > { %v2508_v29 = vpop.eup %2507 }
 0x35e   : > { %v2510_v34 = vpop.eup %2509 }
 0x360   : > { %v2512_v43 = vpop.eup %2511 }
 0x361   : > { %v2514_v33 = vpop.eup %2513  ;;  %v1144_v44 = vadd.bf16 %v2512_v43, %v2506_v28 }
 0x362   : > { %v2516_v45 = vpop.eup %2515  ;;  %v1143_v46 = vadd.bf16 %v2514_v33, %v2510_v34 }
 0x363   : > { %v2518_v47 = vpop.eup %2517  ;;  %1245 = vmatprep.subr.bf16.mxu1 %v1144_v44  ;;  %v1142_v48 = vadd.bf16 %v2516_v45, %v2508_v29 }
 0x364   : > { %1246 = vmatpush1.bf16.msra.mxu1 %v1143_v46  ;;  %v2520_v49 = vpop.eup %2519 }
 0x365   : > { %1247 = vmatprep.subr.bf16.mxu1 %v1142_v48  ;;  %v1141_v38 = vadd.bf16 %v2520_v49, %v2518_v47  ;;  %v2484_v48 = vld [vmem:[#allocation12] sm:$0xff]   ;;  %v2485_v49 = vld [vmem:[#allocation12 + $0x8] sm:$0xff]  }
 0x368   : > { %1248 = vmatpush1.bf16.msra.mxu1 %v1141_v38  ;;  %v2486_v38 = vld [vmem:[#allocation12 + $0x10] sm:$0xff]  }
 0x36b   : > { %2270 = vmatmul.mubr.msk.bf16.vlgmr.msra.gmra.mxu1 %vm903_vm1, %v2480_v30  ;;  %v2487_v30 = vld [vmem:[#allocation12 + $0x18] sm:$0xff]  }
 0x36c   : > { %1275 = vmatprep.mubr.bf16.mxu1 %v2764_v16 }
 0x373   : > { %2271 = vmatmul.mubr.msk.bf16.gmra.mxu1 %vm903_vm1, %v2481_v37 }
 0x374   : > { %1285 = vmatprep.mubr.bf16.mxu1 %v2764_v16 }
 0x37b   : > { %2272 = vmatmul.mubr.msk.bf16.gmra.mxu1 %vm903_vm1, %v2482_v39 }
 0x37c   : > { %1295 = vmatprep.mubr.bf16.mxu1 %v2764_v16 }
 0x383   : > { %2273 = vmatmul.mubr.msk.bf16.gmra.mxu1 %vm903_vm1, %v2483_v40 }
 0x384   : > { %1553 = vmatprep.mubr.bf16.mxu1 %v2764_v16 }
 0x42b   : > { %v1267_v42 = vpop.f32.mrf.mxu1 }
 0x42c   : > { %v1268_v41 = vadd.f32 %v1267_v42, %v1164_v26 }
 0x42d   : > { %v1269_v50 = vpop.f32.mrf.mxu1 }
 0x42e   : > { %v1270_v31 = vadd.f32 %v1269_v50, %v1164_v26 }
 0x42f   : > { %v1271_v51 = vpop.f32.mrf.mxu1 }
 0x430   : > { %v1272_v32 = vadd.f32 %v1271_v51, %v1169_v22 }
 0x431   : > { %v1273_v52 = vpop.f32.mrf.mxu1 }
 0x432   : > { %v1274_v25 = vadd.f32 %v1273_v52, %v1169_v22  ;;  %v1306_v28 = vpack.c.bf16 %v1272_v32, %v1268_v41 }
 0x433   : > { %v1277_v53 = vpop.f32.mrf.mxu1 }
 0x434   : > { %v1278_v27 = vadd.f32 %v1277_v53, %v1174_v57  ;;  %v1307_v35 = vpack.c.bf16 %v1274_v25, %v1270_v31 }
 0x435   : > { %v1279_v54 = vpop.f32.mrf.mxu1 }
 0x436   : > { %v1280_v21 = vadd.f32 %v1279_v54, %v1174_v57 }
 0x437   : > { %v1281_v55 = vpop.f32.mrf.mxu1 }
 0x438   : > { %v1282_v23 = vadd.f32 %v1281_v55, %v1179_v10  ;;  %v1376_v55 = vpop.permute.xlu1 %1375 }
 0x439   : > { %v1283_v58 = vpop.f32.mrf.mxu1 }
 0x43a   : > { %v1284_v15 = vadd.f32 %v1283_v58, %v1179_v10  ;;  %v1308_v36 = vpack.c.bf16 %v1282_v23, %v1278_v27 }
 0x43b   : > { %v1287_v59 = vpop.f32.mrf.mxu1 }
 0x43c   : > { %v1288_v20 = vadd.f32 %v1287_v59, %v1184_v5  ;;  %v1309_v24 = vpack.c.bf16 %v1284_v15, %v1280_v21  ;;  %v1371_v59 = vpop.permute.xlu0 %1370 }
 0x43d   : > { %v1289_v63 = vpop.f32.mrf.mxu1 }
 0x43e   : > { %v1290_v13 = vadd.f32 %v1289_v63, %v1184_v5 }
 0x43f   : > { %v1291_v1 = vpop.f32.mrf.mxu1 }
 0x440   : > { %v1292_v61 = vadd.f32 %v1291_v1, %v1189_v3 }
 0x441   : > { %v1293_v2 = vpop.f32.mrf.mxu1 }
 0x442   : > { %v1294_v8 = vadd.f32 %v1293_v2, %v1189_v3  ;;  %v1310_v19 = vpack.c.bf16 %v1292_v61, %v1288_v20 }
 0x443   : > { %v1297_v4 = vpop.f32.mrf.mxu1 }
 0x444   : > { %v1298_v11 = vadd.f32 %v1297_v4, %v1194_v0  ;;  %v1311_v17 = vpack.c.bf16 %v1294_v8, %v1290_v13 }
 0x445   : > { %v1299_v6 = vpop.f32.mrf.mxu1 }
 0x446   : > { %v1300_v14 = vadd.f32 %v1299_v6, %v1194_v0  ;;  %v1366_v0 = vpop.permute.xlu1 %1365 }
 0x447   : > { %v1301_v7 = vpop.f32.mrf.mxu1 }
 0x448   : > { %v1302_v9 = vadd.f32 %v1301_v7, %v1199_v60 }
 0x449   : > { %v1303_v12 = vpop.f32.mrf.mxu1 }
 0x44a   : > { %v1304_v56 = vadd.f32 %v1303_v12, %v1199_v60  ;;  %v1312_v62 = vpack.c.bf16 %v1302_v9, %v1298_v11  ;;  %v1356_v6 = vpop.permute.xlu1 %1355 }
 0x44c   : > { %v1313_v18 = vpack.c.bf16 %v1304_v56, %v1300_v14 }
 0x44e   : > { %2521 = vtanh.bf16 %v1313_v18 }
 0x44f   : > { %2523 = vtanh.bf16 %v1312_v62 }
 0x450   : > { %2525 = vtanh.bf16 %v1311_v17  ;;  %v1346_v17 = vpop.permute.xlu1 %1345 }
 0x451   : > { %2527 = vtanh.bf16 %v1310_v19 }
 0x452   : > { %2529 = vtanh.bf16 %v1309_v24 }
 0x453   : > { %2531 = vtanh.bf16 %v1308_v36 }
 0x454   : > { %2533 = vtanh.bf16 %v1307_v35 }
 0x455   : > { %2535 = vtanh.bf16 %v1306_v28 }
 0x45c   : > { %v2522_v29 = vpop.eup %2521 }
 0x45d   : > { %v2524_v34 = vpop.eup %2523  ;;  %1418 = vmatprep.subr.bf16.mxu0 %v2522_v29 }
 0x45e   : > { %v2526_v43 = vpop.eup %2525  ;;  %1419 = vmatpush1.bf16.msra.mxu0 %v2524_v34 }
 0x45f   : > { %1420 = vmatprep.subr.bf16.mxu0 %v2526_v43  ;;  %v2528_v33 = vpop.eup %2527 }
 0x460   : > { %v2530_v44 = vpop.eup %2529 }
 0x461   : > { %v2532_v45 = vpop.eup %2531 }
 0x462   : > { %1421 = vmatpush1.bf16.msra.mxu0 %v2528_v33  ;;  %v2534_v46 = vpop.eup %2533 }
 0x463   : > { %1422 = vmatprep.subr.bf16.mxu0 %v2530_v44  ;;  %v2536_v47 = vpop.eup %2535  ;;  %v2488_v44 = vld [vmem:[%s3512_s12] sm:$0xff]  }
 0x466   : > { %1423 = vmatpush1.bf16.msra.mxu0 %v2532_v45  ;;  %v1571_v45 = vlaneseq }
 0x467   : > { %1424 = vmatprep.subr.bf16.mxu0 %v2534_v46 }
 0x468   : > { %v3251_v46 = vshrl.u32 %v1571_v45, 7 }
 0x46a   : > { %1425 = vmatpush1.bf16.msra.mxu0 %v2536_v47  ;;  %v1818_v47 = vadd.s32 248, %v3251_v46  ;;  %v1788_v45 = vadd.s32 8, %v3251_v46 }
 0x46d   : > { %2278 = vmatmul.mubr.msk.bf16.vlgmr.msra.gmra.mxu0 %vm797_vm0, %v2484_v48  ;;  %v3255_v48 = vstv %s2287_s19 }
 0x46e   : > { %1452 = vmatprep.mubr.bf16.mxu0 %v2764_v16 }
 0x475   : > { %2279 = vmatmul.mubr.msk.bf16.gmra.mxu0 %vm797_vm0, %v2485_v49  ;;  %v1802_v49 = vadd.s32 120, %v3251_v46 }
 0x476   : > { %1462 = vmatprep.mubr.bf16.mxu0 %v2764_v16 }
 0x47d   : > { %2280 = vmatmul.mubr.msk.bf16.gmra.mxu0 %vm797_vm0, %v2486_v38  ;;  %v1851_v38 = vadd.s32 %v3255_v48, %v1818_v47  ;;  %v1803_v47 = vadd.s32 128, %v3251_v46 }
 0x47e   : > { %1472 = vmatprep.mubr.bf16.mxu0 %v2764_v16  ;;  %v1361_v16 = vpop.permute.xlu0 %1360 }
 0x482   : > { %v1351_v12 = vpop.permute.xlu0 %1350 }
 0x485   : > { %2281 = vmatmul.mubr.msk.bf16.gmra.mxu0 %vm797_vm0, %v2487_v30  ;;  %v1817_v30 = vadd.s32 240, %v3251_v46 }
 0x486   : > { %v1341_v23 = vpop.permute.xlu0 %1340 }
 0x52d   : > { %v1444_v37 = vpop.f32.mrf.mxu0 }
 0x52e   : > { %v1445_v31 = vadd.f32 %v1444_v37, %v1341_v23  ;;  %v3260_v37 = vld [vmem:[#allocation7] ss:$0 sm:$0xff] }
 0x52f   : > { %v1446_v39 = vpop.f32.mrf.mxu0  ;;  %vm1888_vm2 = vcmp.ge.s32.totalorder %v1851_v38, %v3260_v37 }
 0x530   : > { %v1447_v25 = vadd.f32 %v1446_v39, %v1341_v23  ;;  %v3262_v39 = vld [vmem:[#allocation7 + $0x1] ss:$0 sm:$0xff]  ;;  %v1792_v23 = vadd.s32 40, %v3251_v46 }
 0x531   : > { %v1448_v40 = vpop.f32.mrf.mxu0  ;;  %vm1925_vm3 = vcmp.lt.s32.totalorder %v1851_v38, %v3262_v39  ;;  %v1836_v38 = vadd.s32 %v3255_v48, %v1803_v47 }
 0x532   : > { %v1449_v24 = vadd.f32 %v1448_v40, %v1346_v17  ;;  %v1835_v40 = vadd.s32 %v3255_v48, %v1802_v49  ;;  %vm1957_vm4 = vmand %vm1888_vm2, %vm1925_vm3  ;;  %v1821_v49 = vadd.s32 %v3255_v48, %v1788_v45 }
 0x533   : > { %v1450_v42 = vpop.f32.mrf.mxu0 }
 0x534   : > { %v1451_v21 = vadd.f32 %v1450_v42, %v1346_v17  ;;  %v1483_v32 = vpack.c.bf16 %v1449_v24, %v1445_v31  ;;  %v1801_v42 = vadd.s32 112, %v3251_v46  ;;  %vm1872_vm5 = vcmp.ge.s32.totalorder %v1835_v40, %v3260_v37 }
 0x535   : > { %v1454_v50 = vpop.f32.mrf.mxu0  ;;  %vm1909_vm6 = vcmp.lt.s32.totalorder %v1835_v40, %v3262_v39  ;;  %v1793_v17 = vadd.s32 48, %v3251_v46  ;;  %v1825_v24 = vadd.s32 %v3255_v48, %v1792_v23  ;;  %v1806_v31 = vadd.s32 152, %v3251_v46 }
 0x536   : > { %v1455_v19 = vadd.f32 %v1454_v50, %v1351_v12  ;;  %v1484_v27 = vpack.c.bf16 %v1451_v21, %v1447_v25  ;;  %v1850_v50 = vadd.s32 %v3255_v48, %v1817_v30  ;;  %vm1941_vm7 = vmand %vm1872_vm5, %vm1909_vm6  ;;  %v1820_v30 = vadd.s32 %v3255_v48, %v3251_v46 }
 0x537   : > { %v1456_v51 = vpop.f32.mrf.mxu0  ;;  %v1826_v21 = vadd.s32 %v3255_v48, %v1793_v17 }
 0x538   : > { %v1457_v15 = vadd.f32 %v1456_v51, %v1351_v12  ;;  %v1816_v51 = vadd.s32 232, %v3251_v46  ;;  %vm1887_vm8 = vcmp.ge.s32.totalorder %v1850_v50, %v3260_v37  ;;  %vm1924_vm9 = vcmp.lt.s32.totalorder %v1850_v50, %v3262_v39 }
 0x539   : > { %v1458_v52 = vpop.f32.mrf.mxu0  ;;  %vm1956_vm10 = vmand %vm1887_vm8, %vm1924_vm9  ;;  %v1811_v12 = vadd.s32 192, %v3251_v46 }
 0x53a   : > { %v1459_v18 = vadd.f32 %v1458_v52, %v1356_v6  ;;  %v1834_v52 = vadd.s32 %v3255_v48, %v1801_v42 }
 0x53b   : > { %v1460_v53 = vpop.f32.mrf.mxu0 }
 0x53c   : > { %v1461_v56 = vadd.f32 %v1460_v53, %v1356_v6  ;;  %v1485_v26 = vpack.c.bf16 %v1459_v18, %v1455_v19  ;;  %v2765_v53 = vmov 1.0   ;;  %vm1871_vm11 = vcmp.ge.s32.totalorder %v1834_v52, %v3260_v37 }
 0x53d   : > { %v1464_v54 = vpop.f32.mrf.mxu0  ;;  %2328 = vmatprep.subr.msk.mxu0 %vm1957_vm4, %v2765_v53  ;;  %vm1908_vm12 = vcmp.lt.s32.totalorder %v1834_v52, %v3262_v39  ;;  %v1797_v6 = vadd.s32 80, %v3251_v46  ;;  %v1807_v19 = vadd.s32 160, %v3251_v46 }
 0x53e   : > { %v1465_v62 = vadd.f32 %v1464_v54, %v1361_v16  ;;  %v1486_v22 = vpack.c.bf16 %v1461_v56, %v1457_v15  ;;  %v1849_v54 = vadd.s32 %v3255_v48, %v1816_v51  ;;  %2329 = vmatpush3.msk.msra.mxu0 %vm1941_vm7, %v2765_v53  ;;  %vm1940_vm13 = vmand %vm1871_vm11, %vm1908_vm12  ;;  %v1844_v56 = vadd.s32 %v3255_v48, %v1811_v12  ;;  %v1506_v51 = vpop.permute.xlu0 %1505 }
 0x53f   : > { %v1466_v58 = vpop.f32.mrf.mxu0  ;;  %2330 = vmatprep.subr.msk.mxu0 %vm1956_vm10, %v2765_v53  ;;  %v1809_v15 = vadd.s32 176, %v3251_v46 }
 0x540   : > { %v1467_v9 = vadd.f32 %v1466_v58, %v1361_v16  ;;  %v1815_v58 = vadd.s32 224, %v3251_v46  ;;  %vm1886_vm14 = vcmp.ge.s32.totalorder %v1849_v54, %v3260_v37  ;;  %vm1923_vm15 = vcmp.lt.s32.totalorder %v1849_v54, %v3262_v39  ;;  %2331 = vmatpush3.msk.msra.mxu0 %vm1940_vm13, %v2765_v53 }
 0x541   : > { %v1468_v60 = vpop.f32.mrf.mxu0  ;;  %v1798_v16 = vadd.s32 88, %v3251_v46 }
 0x542   : > { %v1469_v13 = vadd.f32 %v1468_v60, %v1366_v0 }
 0x543   : > { %v1470_v63 = vpop.f32.mrf.mxu0 }
 0x544   : > { %v1471_v4 = vadd.f32 %v1470_v63, %v1366_v0  ;;  %v1487_v20 = vpack.c.bf16 %v1469_v13, %v1465_v62  ;;  %v1814_v63 = vadd.s32 216, %v3251_v46  ;;  %v1848_v0 = vadd.s32 %v3255_v48, %v1815_v58 }
 0x545   : > { %v1474_v1 = vpop.f32.mrf.mxu0  ;;  %v1795_v13 = vadd.s32 64, %v3251_v46  ;;  %v1794_v62 = vadd.s32 56, %v3251_v46 }
 0x546   : > { %v1475_v7 = vadd.f32 %v1474_v1, %v1371_v59  ;;  %v1488_v57 = vpack.c.bf16 %v1471_v4, %v1467_v9  ;;  %vm1885_vm4 = vcmp.ge.s32.totalorder %v1848_v0, %v3260_v37  ;;  %vm1922_vm5 = vcmp.lt.s32.totalorder %v1848_v0, %v3262_v39 }
 0x547   : > { %v1476_v2 = vpop.f32.mrf.mxu0  ;;  %vm1954_vm8 = vmand %vm1885_vm4, %vm1922_vm5  ;;  %v1831_v4 = vadd.s32 %v3255_v48, %v1798_v16  ;;  %v1830_v9 = vadd.s32 %v3255_v48, %v1797_v6  ;;  %v1827_v18 = vadd.s32 %v3255_v48, %v1794_v62  ;;  %v3432_v0 = vsub.s32 1, %v3251_v46 }
 0x548   : > { %v1477_v10 = vadd.f32 %v1476_v2, %v1371_v59  ;;  %v1799_v59 = vadd.s32 96, %v3251_v46  ;;  %v1847_v2 = vadd.s32 %v3255_v48, %v1814_v63 }
 0x549   : > { %v1478_v3 = vpop.f32.mrf.mxu0  ;;  %vm1868_vm13 = vcmp.ge.s32.totalorder %v1831_v4, %v3260_v37  ;;  %vm1904_vm4 = vcmp.lt.s32.totalorder %v1830_v9, %v3262_v39 }
 0x54a   : > { %v1479_v5 = vadd.f32 %v1478_v3, %v1376_v55  ;;  %v1832_v1 = vadd.s32 %v3255_v48, %v1799_v59  ;;  %v1813_v3 = vadd.s32 208, %v3251_v46  ;;  %vm1884_vm9 = vcmp.ge.s32.totalorder %v1847_v2, %v3260_v37 }
 0x54b   : > { %v1480_v8 = vpop.f32.mrf.mxu0  ;;  %vm1921_vm10 = vcmp.lt.s32.totalorder %v1847_v2, %v3262_v39 }
 0x54c   : > { %v1481_v11 = vadd.f32 %v1480_v8, %v1376_v55  ;;  %v1489_v14 = vpack.c.bf16 %v1479_v5, %v1475_v7  ;;  %v1800_v55 = vadd.s32 104, %v3251_v46  ;;  %vm1869_vm6 = vcmp.ge.s32.totalorder %v1832_v1, %v3260_v37  ;;  %vm1953_vm12 = vmand %vm1884_vm9, %vm1921_vm10 }
 0x54d   : > { %vm1906_vm7 = vcmp.lt.s32.totalorder %v1832_v1, %v3262_v39  ;;  %v1846_v5 = vadd.s32 %v3255_v48, %v1813_v3  ;;  %v1812_v7 = vadd.s32 200, %v3251_v46  ;;  %v1796_v8 = vadd.s32 72, %v3251_v46 }
 0x54e   : > { %v1490_v61 = vpack.c.bf16 %v1481_v11, %v1477_v10  ;;  %v1833_v60 = vadd.s32 %v3255_v48, %v1800_v55  ;;  %vm1938_vm11 = vmand %vm1869_vm6, %vm1906_vm7 }
 0x54f   : > { %v1845_v10 = vadd.s32 %v3255_v48, %v1812_v7  ;;  %v1829_v11 = vadd.s32 %v3255_v48, %v1796_v8 }
 0x550   : > { %2537 = vtanh.bf16 %v1490_v61  ;;  %vm1870_vm1 = vcmp.ge.s32.totalorder %v1833_v60, %v3260_v37  ;;  %vm1907_vm2 = vcmp.lt.s32.totalorder %v1833_v60, %v3262_v39  ;;  %v1564_v60 = vld [vmem:[%s3009_s4] sm:$0x3]  ;;  %s3555_s4 = sld [smem:[#allocation21_spill]] }
 0x551   : > { %2539 = vtanh.bf16 %v1489_v14  ;;  %vm1939_vm3 = vmand %vm1870_vm1, %vm1907_vm2  ;;  %v1810_v14 = vadd.s32 184, %v3251_v46  ;;  %vm1882_vm5 = vcmp.ge.s32.totalorder %v1845_v10, %v3260_v37  ;;  %vm1919_vm6 = vcmp.lt.s32.totalorder %v1845_v10, %v3262_v39 }
 0x552   : > { %2541 = vtanh.bf16 %v1488_v57  ;;  %vm1903_vm9 = vcmp.lt.s32.totalorder %v1829_v11, %v3262_v39  ;;  %v1828_v57 = vadd.s32 %v3255_v48, %v1795_v13  ;;  %vm1951_vm10 = vmand %vm1882_vm5, %vm1919_vm6  ;;  %vm1864_vm5 = vcmp.ge.s32.totalorder %v1827_v18, %v3260_v37 }
 0x553   : > { %2543 = vtanh.bf16 %v1487_v20  ;;  %v1843_v61 = vadd.s32 %v3255_v48, %v1810_v14  ;;  %v1842_v20 = vadd.s32 %v3255_v48, %v1809_v15  ;;  %vm1901_vm6 = vcmp.lt.s32.totalorder %v1827_v18, %v3262_v39 }
 0x554   : > { %2545 = vtanh.bf16 %v1486_v22  ;;  %v1808_v22 = vadd.s32 168, %v3251_v46  ;;  %v1697_v13 = vmul.f32 0.999999, %v1564_v60 }
 0x555   : > { %2547 = vtanh.bf16 %v1485_v26  ;;  %v1840_v26 = vadd.s32 %v3255_v48, %v1807_v19 }
 0x556   : > { %2549 = vtanh.bf16 %v1484_v27  ;;  %v1841_v25 = vadd.s32 %v3255_v48, %v1808_v22  ;;  %v1791_v27 = vadd.s32 32, %v3251_v46  ;;  %p3557_p7 = scmp.ne.s32.totalorder %s3555_s4, 0 }
 0x557   : > { %2551 = vtanh.bf16 %v1483_v32  ;;  %v1790_v32 = vadd.s32 24, %v3251_v46 }
 0x558   : > { %p2685_p4 = pnand %p2684_p3, %p3557_p7 }
 0x55a   : > { %p2686_p5 = pneg %p2685_p4 }
 0x55c   : > { %p2693_p12 = pnand %p2692_p0, %p2686_p5 }
 0x55e   : > { %v2538_v36 = vpop.eup %2537 }
 0x55f   : > { %v2540_v35 = vpop.eup %2539  ;;  %1529 = vmatprep.subr.bf16.mxu1 %v2538_v36  ;;  %v1824_v36 = vadd.s32 %v3255_v48, %v1791_v27 }
 0x560   : > { %v2542_v41 = vpop.eup %2541  ;;  %1530 = vmatpush1.bf16.msra.mxu1 %v2540_v35  ;;  %v1839_v35 = vadd.s32 %v3255_v48, %v1806_v31 }
 0x561   : > { %1531 = vmatprep.subr.bf16.mxu1 %v2542_v41  ;;  %v2544_v28 = vpop.eup %2543  ;;  %v1823_v41 = vadd.s32 %v3255_v48, %v1790_v32 }
 0x562   : > { %v2546_v29 = vpop.eup %2545 }
 0x563   : > { %v2548_v34 = vpop.eup %2547 }
 0x564   : > { %1532 = vmatpush1.bf16.msra.mxu1 %v2544_v28  ;;  %v2550_v43 = vpop.eup %2549  ;;  %v1805_v28 = vadd.s32 144, %v3251_v46 }
 0x565   : > { %1533 = vmatprep.subr.bf16.mxu1 %v2546_v29  ;;  %v2552_v33 = vpop.eup %2551  ;;  %v1789_v29 = vadd.s32 16, %v3251_v46 }
 0x568   : > { %1534 = vmatpush1.bf16.msra.mxu1 %v2548_v34  ;;  %v1804_v34 = vadd.s32 136, %v3251_v46 }
 0x569   : > { %1535 = vmatprep.subr.bf16.mxu1 %v2550_v43  ;;  %v1838_v43 = vadd.s32 %v3255_v48, %v1805_v28 }
 0x56c   : > { %1536 = vmatpush1.bf16.msra.mxu1 %v2552_v33  ;;  %v1822_v33 = vadd.s32 %v3255_v48, %v1789_v29 }
 0x56f   : > { %2283 = vmatmul.mubr.msk.bf16.vlgmr.msra.gmra.mxu1 %vm797_vm0, %v2488_v44  ;;  %vm1955_vm0 = vmand %vm1886_vm14, %vm1923_vm15  ;;  %vm1905_vm14 = vcmp.lt.s32.totalorder %v1831_v4, %v3262_v39  ;;  %vm1883_vm15 = vcmp.ge.s32.totalorder %v1846_v5, %v3260_v37  ;;  %v1837_v44 = vadd.s32 %v3255_v48, %v1804_v34  ;;  %v2766_v48 = vmov 1966171168  }
 0x570   : > { %2332 = vmatprep.subr.msk.mxu0 %vm1955_vm0, %v2765_v53  ;;  %vm1920_vm0 = vcmp.lt.s32.totalorder %v1846_v5, %v3262_v39  ;;  %vm1937_vm1 = vmand %vm1868_vm13, %vm1905_vm14  ;;  %vm1918_vm13 = vcmp.lt.s32.totalorder %v1844_v56, %v3262_v39  ;;  %vm1865_vm14 = vcmp.ge.s32.totalorder %v1828_v57, %v3260_v37  ;;  %v1569_v40 = vunpack.c.l.s4 %v2766_v48 }
 0x571   : > { %2333 = vmatpush3.msk.msra.mxu0 %vm1939_vm3, %v2765_v53  ;;  %vm1952_vm2 = vmand %vm1883_vm15, %vm1920_vm0  ;;  %vm1867_vm3 = vcmp.ge.s32.totalorder %v1830_v9, %v3260_v37  ;;  %vm1902_vm15 = vcmp.lt.s32.totalorder %v1828_v57, %v3262_v39  ;;  %v1698_v57 = vmul.f32 %v1697_v13, %v1697_v13 }
 0x572   : > { %2334 = vmatprep.subr.msk.mxu0 %vm1954_vm8, %v2765_v53  ;;  %vm1936_vm7 = vmand %vm1867_vm3, %vm1904_vm4  ;;  %vm1866_vm8 = vcmp.ge.s32.totalorder %v1829_v11, %v3260_v37  ;;  %v1570_v42 = vunpack.c.0.s8 %v1569_v40 }
 0x573   : > { %2335 = vmatpush3.msk.msra.mxu0 %vm1938_vm11, %v2765_v53  ;;  %vm1935_vm11 = vmand %vm1866_vm8, %vm1903_vm9  ;;  %vm1916_vm8 = vcmp.lt.s32.totalorder %v1842_v20, %v3262_v39  ;;  %v1699_v15 = vmul.f32 2.0, %v1698_v57  ;;  %v1701_v18 = vmul.f32 4.0, %v1698_v57 }
 0x574   : > { %2336 = vmatprep.subr.msk.mxu0 %vm1953_vm12, %v2765_v53  ;;  %vm1881_vm12 = vcmp.ge.s32.totalorder %v1844_v56, %v3260_v37  ;;  %vm1934_vm3 = vmand %vm1865_vm14, %vm1902_vm15  ;;  %vm1878_vm14 = vcmp.ge.s32.totalorder %v1841_v25, %v3260_v37  ;;  %vm1915_vm15 = vcmp.lt.s32.totalorder %v1841_v25, %v3262_v39 }
 0x575   : > { %2337 = vmatpush3.msk.msra.mxu0 %vm1937_vm1, %v2765_v53  ;;  %vm1950_vm0 = vmand %vm1881_vm12, %vm1918_vm13  ;;  %vm1880_vm1 = vcmp.ge.s32.totalorder %v1843_v61, %v3260_v37  ;;  %v2284_v22 = vadd.f32 -1.0, %v1699_v15  ;;  %v2285_v25 = vadd.f32 -3.0, %v1701_v18 }
 0x576   : > { %2338 = vmatprep.subr.msk.mxu0 %vm1952_vm2, %v2765_v53  ;;  %vm1917_vm2 = vcmp.lt.s32.totalorder %v1843_v61, %v3262_v39  ;;  %vm1933_vm9 = vmand %vm1864_vm5, %vm1901_vm6 }
 0x577   : > { %2339 = vmatpush3.msk.msra.mxu0 %vm1936_vm7, %v2765_v53  ;;  %vm1949_vm4 = vmand %vm1880_vm1, %vm1917_vm2  ;;  %vm1879_vm7 = vcmp.ge.s32.totalorder %v1842_v20, %v3260_v37  ;;  %vm1899_vm1 = vcmp.lt.s32.totalorder %v1825_v24, %v3262_v39  ;;  %v1703_v31 = vmul.f32 %v2285_v25, %v1697_v13  ;;  %v1736_v34 = vrot.slane %v2284_v22, %v3432_v0 }
 0x578   : > { %2340 = vmatprep.subr.msk.mxu0 %vm1951_vm10, %v2765_v53  ;;  %vm1863_vm10 = vcmp.ge.s32.totalorder %v1826_v21, %v3260_v37  ;;  %vm1948_vm12 = vmand %vm1879_vm7, %vm1916_vm8  ;;  %vm1861_vm7 = vcmp.ge.s32.totalorder %v1824_v36, %v3260_v37  ;;  %vm1898_vm8 = vcmp.lt.s32.totalorder %v1824_v36, %v3262_v39 }
 0x579   : > { %2341 = vmatpush3.msk.msra.mxu0 %vm1935_vm11, %v2765_v53  ;;  %vm1900_vm11 = vcmp.lt.s32.totalorder %v1826_v21, %v3262_v39  ;;  %vm1947_vm2 = vmand %vm1878_vm14, %vm1915_vm15 }
 0x57a   : > { %2342 = vmatprep.subr.msk.mxu0 %vm1950_vm0, %v2765_v53  ;;  %vm1932_vm13 = vmand %vm1863_vm10, %vm1900_vm11  ;;  %vm1862_vm0 = vcmp.ge.s32.totalorder %v1825_v24, %v3260_v37  ;;  %vm1913_vm10 = vcmp.lt.s32.totalorder %v1839_v35, %v3262_v39 }
 0x57b   : > { %2343 = vmatpush3.msk.msra.mxu0 %vm1934_vm3, %v2765_v53  ;;  %vm1877_vm3 = vcmp.ge.s32.totalorder %v1840_v26, %v3260_v37  ;;  %vm1931_vm5 = vmand %vm1862_vm0, %vm1899_vm1  ;;  %vm1875_vm0 = vcmp.ge.s32.totalorder %v1838_v43, %v3260_v37  ;;  %vm1912_vm1 = vcmp.lt.s32.totalorder %v1838_v43, %v3262_v39 }
 0x57c   : > { %2344 = vmatprep.subr.msk.mxu0 %vm1949_vm4, %v2765_v53  ;;  %vm1914_vm4 = vcmp.lt.s32.totalorder %v1840_v26, %v3262_v39  ;;  %vm1930_vm11 = vmand %vm1861_vm7, %vm1898_vm8  ;;  %v1704_v26 = vmul.f32 2.0, %v2284_v22 }
 0x57d   : > { %2345 = vmatpush3.msk.msra.mxu0 %vm1933_vm9, %v2765_v53  ;;  %vm1946_vm6 = vmand %vm1877_vm3, %vm1914_vm4  ;;  %vm1876_vm9 = vcmp.ge.s32.totalorder %v1839_v35, %v3260_v37  ;;  %vm1896_vm3 = vcmp.lt.s32.totalorder %v1822_v33, %v3262_v39  ;;  %v1715_v35 = vrot.slane %v1697_v13, %v3432_v0 }
 0x57e   : > { %2346 = vmatprep.subr.msk.mxu0 %vm1948_vm12, %v2765_v53  ;;  %vm1860_vm12 = vcmp.ge.s32.totalorder %v1823_v41, %v3260_v37  ;;  %vm1945_vm14 = vmand %vm1876_vm9, %vm1913_vm10  ;;  %vm1858_vm9 = vcmp.ge.s32.totalorder %v1821_v49, %v3260_v37  ;;  %vm1895_vm10 = vcmp.lt.s32.totalorder %v1821_v49, %v3262_v39  ;;  %v1757_v49 = vrot.slane %v1703_v31, %v3432_v0 }
 0x57f   : > { %2347 = vmatpush3.msk.msra.mxu0 %vm1932_vm13, %v2765_v53  ;;  %vm1897_vm13 = vcmp.lt.s32.totalorder %v1823_v41, %v3262_v39  ;;  %vm1944_vm4 = vmand %vm1875_vm0, %vm1912_vm1  ;;  %v1705_v41 = vmul.f32 %v2284_v22, %v1704_v26 }
 0x580   : > { %2348 = vmatprep.subr.msk.mxu0 %vm1947_vm2, %v2765_v53  ;;  %vm1929_vm15 = vmand %vm1860_vm12, %vm1897_vm13  ;;  %vm1859_vm2 = vcmp.ge.s32.totalorder %v1822_v33, %v3260_v37  ;;  %vm1910_vm12 = vcmp.lt.s32.totalorder %v1836_v38, %v3262_v39 }
 0x581   : > { %2349 = vmatpush3.msk.msra.mxu0 %vm1931_vm5, %v2765_v53  ;;  %vm1874_vm5 = vcmp.ge.s32.totalorder %v1837_v44, %v3260_v37  ;;  %vm1928_vm7 = vmand %vm1859_vm2, %vm1896_vm3 }
 0x582   : > { %2350 = vmatprep.subr.msk.mxu0 %vm1946_vm6, %v2765_v53  ;;  %vm1911_vm6 = vcmp.lt.s32.totalorder %v1837_v44, %v3262_v39  ;;  %vm1927_vm13 = vmand %vm1858_vm9, %vm1895_vm10 }
 0x583   : > { %2351 = vmatpush3.msk.msra.mxu0 %vm1930_vm11, %v2765_v53  ;;  %vm1943_vm8 = vmand %vm1874_vm5, %vm1911_vm6  ;;  %vm1873_vm11 = vcmp.ge.s32.totalorder %v1836_v38, %v3260_v37  ;;  %v2286_v38 = vadd.f32 -1.0, %v1705_v41 }
 0x584   : > { %2352 = vmatprep.subr.msk.mxu0 %vm1945_vm14, %v2765_v53  ;;  %vm1857_vm14 = vcmp.ge.s32.totalorder %v1820_v30, %v3260_v37  ;;  %vm1942_vm0 = vmand %vm1873_vm11, %vm1910_vm12 }
 0x585   : > { %2353 = vmatpush3.msk.msra.mxu0 %vm1929_vm15, %v2765_v53  ;;  %vm1894_vm15 = vcmp.lt.s32.totalorder %v1820_v30, %v3262_v39  ;;  %v1573_v39 = vsub.s32 %v1570_v42, %v3251_v46 }
 0x586   : > { %2354 = vmatprep.subr.msk.mxu0 %vm1944_vm4, %v2765_v53  ;;  %vm1926_vm1 = vmand %vm1857_vm14, %vm1894_vm15 }
 0x587   : > { %2355 = vmatpush3.msk.msra.mxu0 %vm1928_vm7, %v2765_v53 }
 0x588   : > { %2356 = vmatprep.subr.msk.mxu0 %vm1943_vm8, %v2765_v53 }
 0x589   : > { %2357 = vmatpush3.msk.msra.mxu0 %vm1927_vm13, %v2765_v53 }
 0x58a   : > { %2358 = vmatprep.subr.msk.mxu0 %vm1942_vm0, %v2765_v53 }
 0x58b   : > { %2359 = vmatpush3.msk.msra.mxu0 %vm1926_vm1, %v2765_v53  ;;  %v3429_v53 = vsub.s32 0, %v3251_v46 }
 0x58d   : > { %v1711_v32 = vrot.slane %v1697_v13, %v3429_v53  ;;  %v1732_v28 = vrot.slane %v2284_v22, %v3429_v53  ;;  %v1753_v44 = vrot.slane %v1703_v31, %v3429_v53 }
 0x62f   : > { %v1555_v50 = vpop.f32.mrf.mxu1 }
 0x630   : > { %v3420_v54 = vadd.f32 %v1555_v50, %v1506_v51 }
 0x631   : > { %v1557_v52 = vpop.f32.mrf.mxu1 }
 0x632   : > { %v3422_v37 = vadd.f32 %v1557_v52, %v1506_v51  ;;  %v1718_v33 = vmul.f32 %v1711_v32, %v3420_v54  ;;  %v1739_v30 = vmul.f32 %v1732_v28, %v3420_v54  ;;  %v1760_v51 = vmul.f32 %v1753_v44, %v3420_v54 }
 0x633   : > { %v1559_v43 = vpop.f32.mrf.mxu1 }
 0x634   : > { %v1567_v55 = vcombine.high %v3420_v54, %v3422_v37  ;;  %v1719_v47 = vmul.f32 %v1715_v35, %v3422_v37  ;;  %v1740_v42 = vmul.f32 %v1736_v34, %v3422_v37  ;;  %v1722_v50 = vrot.slane %v1718_v33, 5 }
 0x635   : > { %v1561_v52 = vpop.f32.mrf.mxu1 }
 0x636   : > { %v1574_v58 = vrot.slane %v1567_v55, %v1573_v39 }
 0x638   : > { %v1581_v59 = vrot.slane %v1574_v58, %v1573_v39 }
 0x63a   : > { %v1583_v63 = vmul.f32 %v1581_v59, %v1564_v60  ;;  %v1723_v59 = vrot.slane %v1719_v47, 5 }
 0x63c   : > { %v1588_v1 = vrot.slane %v1583_v63, %v3429_v53  ;;  %v1592_v16 = vrot.slane %v1583_v63, %v3432_v0 }
 0x63e   : > { %v1595_v2 = vadd.f32 %v1588_v1, %v3420_v54  ;;  %v1596_v3 = vadd.f32 %v1592_v16, %v3422_v37  ;;  %v1743_v1 = vrot.slane %v1739_v30, 6  ;;  %v1774_v16 = vrot.slane %v2286_v38, %v3429_v53 }
 0x640   : > { %v1599_v4 = vcombine.low %v1595_v2, %v1596_v3  ;;  %v1778_v2 = vrot.slane %v2286_v38, %v3432_v0 }
 0x642   : > { %v1606_v5 = vrot.slane %v1599_v4, %v1573_v39 }
 0x644   : > { %v1607_v6 = vcombine.high %v1606_v5, %v1606_v5 }
 0x646   : > { %v1614_v7 = vrot.slane %v1607_v6, %v1573_v39  ;;  %v1744_v6 = vrot.slane %v1740_v42, 6 }
 0x648   : > { %v1615_v8 = vcombine.high %v1614_v7, %v1614_v7 }
 0x64a   : > { %v1617_v9 = vmul.f32 %v1615_v8, %v1564_v60  ;;  %v1764_v8 = vrot.slane %v1760_v51, 7 }
 0x64c   : > { %v1622_v10 = vrot.slane %v1617_v9, %v3429_v53  ;;  %v1626_v11 = vrot.slane %v1617_v9, %v3432_v0 }
 0x64e   : > { %v1629_v46 = vadd.f32 %v1622_v10, %v3420_v54  ;;  %v1630_v12 = vadd.f32 %v1626_v11, %v3422_v37 }
 0x650   : > { %v1633_v14 = vcombine.low %v1629_v46, %v1630_v12 }
 0x652   : > { %v1640_v56 = vrot.slane %v1633_v14, %v1573_v39 }
 0x654   : > { %v1647_v61 = vrot.slane %v1640_v56, %v1573_v39 }
 0x656   : > { %v1648_v62 = vcombine.high %v1647_v61, %v1647_v61 }
 0x658   : > { %v1650_v17 = vmul.f32 %v1648_v62, %v1564_v60 }
 0x65a   : > { %v1655_v20 = vrot.slane %v1650_v17, %v3429_v53  ;;  %v1659_v21 = vrot.slane %v1650_v17, %v3432_v0 }
 0x65c   : > { %v1662_v23 = vadd.f32 %v1655_v20, %v3420_v54  ;;  %v1663_v19 = vadd.f32 %v1659_v21, %v3422_v37 }
 0x65e   : > { %v1666_v24 = vcombine.low %v1662_v23, %v1663_v19 }
 0x660   : > { %v1673_v27 = vrot.slane %v1666_v24, %v1573_v39 }
 0x662   : > { %v1674_v36 = vcombine.high %v1673_v27, %v1673_v27 }
 0x664   : > { %v1681_v29 = vrot.slane %v1674_v36, %v1573_v39  ;;  %v1511_v39 = vpop.permute.xlu1 %1510 }
 0x665   : > { %v1560_v63 = vadd.f32 %v1559_v43, %v1511_v39  ;;  %v1562_v4 = vadd.f32 %v1561_v52, %v1511_v39 }
 0x666   : > { %v1683_v45 = vmul.f32 %v1681_v29, %v1564_v60  ;;  %v1761_v60 = vmul.f32 %v1757_v49, %v3422_v37 }
 0x667   : > { %v1781_v11 = vmul.f32 %v1774_v16, %v1560_v63 }
 0x668   : > { %v1688_v48 = vrot.slane %v1683_v45, %v3429_v53  ;;  %v1692_v40 = vrot.slane %v1683_v45, %v3432_v0  ;;  %v1765_v9 = vrot.slane %v1761_v60, 7 }
 0x66a   : > { %v1695_v55 = vadd.f32 %v1688_v48, %v3420_v54  ;;  %v1696_v58 = vadd.f32 %v1692_v40, %v3422_v37  ;;  %v1782_v37 = vmul.f32 %v1778_v2, %v1562_v4 }
 0x66c   : > { %v1726_v3 = vadd.f32 %v1722_v50, %v1695_v55  ;;  %v1727_v5 = vadd.f32 %v1723_v59, %v1696_v58 }
 0x66e   : > { %v1747_v7 = vadd.f32 %v1743_v1, %v1726_v3  ;;  %v1748_v54 = vadd.f32 %v1744_v6, %v1727_v5 }
 0x670   : > { %v1768_v10 = vadd.f32 %v1764_v8, %v1747_v7  ;;  %v1769_v46 = vadd.f32 %v1765_v9, %v1748_v54 }
 0x672   : > { %v1783_v12 = vadd.f32 %v1781_v11, %v1768_v10  ;;  %v1784_v53 = vadd.f32 %v1782_v37, %v1769_v46 }
 0x674   : > { %2054 = vmatprep.mubr.f32.mxu0 %v1784_v53 }
 0x675   : > { %2055 = vmatmul.mubr.f32.vlgmr.msra.gmra.mxu0 %v1783_v12 }
 0x735   : > { %v2360_v0 = vpop.f32.mrf.mxu0 }
 0x737   : > { %v2361_v13 = vpop.f32.mrf.mxu0 }
 0x738   : > { %v2362_v14 = vadd.f32 %v2361_v13, %v2360_v0 }
 0x73a   : > { %2060 = vst [vmem:[%s706_s18] sm:$0x1] %v2362_v14 }
 0x73b   : > { %2696 = shalt.err (!%p2693_p12)
}
 0x73c   : > { %s2697_s20 = scalar_lea.hbm %s2072_s29, 16  ;;  %s2701_s14 = scalar_lea.hbm %s3556_s3, 32 }
 0x73d   : > { %p2698_p13 = scmp.ne.s32.totalorder %s2072_s29, %s2697_s20  ;;  %p2702_p10 = scmp.lt.s32.totalorder %s2072_s29, %s3556_s3 }
 0x73e   : > { %p2703_p1 = scmp.lt.s32.totalorder %s2701_s14, %s2697_s20 }
 0x73f   : > { %p2699_p8 = pnand %p2698_p13, %p3557_p7 }
 0x740   : > { %p2704_p3 = por %p2703_p1, %p2702_p10 }
 0x741   : > { %p2700_p9 = pneg %p2699_p8 }
 0x743   : > { %p2705_p4 = pnand %p2704_p3, %p2700_p9 }
 0x745   : > { %2708 = shalt.err (!%p2705_p4)
}
 0x746   : > { %2381 = dma.vmem_to_hbm [thread:$0]  (%p3557_p7), %s2075_s28, 16, %s2072_s29, %s2062_s6  }
 0x747 PF: > { %s3558_s18 = sld [smem:[#allocation18_spill]] }
 0x748   : > { %s3559_s26 = sld [smem:[#allocation22_spill]] }
 0x74d   : > { %s2086_s10 = sand.u32 1, %s3558_s18  }
 0x74e   : > { %p3560_p5 = scmp.ne.s32.totalorder %s3559_s26, 0  ;;  %s2087_s24 = scalar_lea.sflag [#allocation4], %s2086_s10 }
 0x750   : > { %p2397_p2 = pnand %p2220_p6, %p3560_p5 }
 0x752   : > { %p2398_p11 = pneg %p2397_p2 }
 0x754   : > { %2738 = dma.done.wait (%p2398_p11), %s2087_s24, 16  }
 0x755   : > { %2740 = vsyncadd (%p2398_p11), %s2087_s24, 4294967280  ;;  %s3561_s16 = sld [smem:[#allocation19_spill]]  ;;  %s3563_s29 = smov %s2747_s30 }
 0x756   : > { %s3562_s27 = sld [smem:[#allocation20_spill]]  ;;  %s3564_s30 = smov %s2751_s15 }
 0x75b   : > { %p29_p0 = scmp.ge.s32.totalorder %s3561_s16, 4  }
 0x75c   : > { %s3565_s15 = smov %s3562_s27 }
 0x75d   :  { %31 = sbr.rel (!%p29_p0) target bundleno = 13 (0xd), region = 229 }
 0x762   :  { %2091 = vsyncpa [#allocation3], 1 }
 0x763   :  { %2093 = vsyncpa [#allocation3 + $0x1], 1 }
 0x764   :  { %2094 = vsyncpa [#allocation8], 1 }
 0x765   :  { %2095 = vsyncpa [#allocation11], 1 }
 0x766   :  { %2096 = vsyncpa [#allocation4], 1 }
 0x767   :  { %2098 = vsyncpa [#allocation4 + $0x1], 1 }

</bundles_post_ra>
